<compile_context>
chip_gen: v7x
topology: tpu7x:2x2x1
jax: 0.10.0
libtpu: 0.0.40
codegen_flags: <defaults>
</compile_context>

<pallas_src>
import functools
import math

import jax
import jax.numpy as jnp
from jax.experimental import pallas as pl
from jax.experimental.pallas import tpu as pltpu


# -----------------------------------------------------------------------------
# Fused kernel: one (batch block, layer) step.  Grid = (B // Bb, L).
# The running activation is carried in y_ref (resident in VMEM across the
# layer axis; written back to HBM only when the batch-block index changes).
# -----------------------------------------------------------------------------
def _fft_kernel(
    x_ref, mask_ref,
    wqkv_ref, bqkv_ref, wo_ref, bo_ref,
    ln1w_ref, ln1b_ref, ln2w_ref, ln2b_ref,
    w1_ref, b1_ref, w2_ref, b2_ref,
    y_ref, attn_ref,
    *, n_heads: int,
):
    l = pl.program_id(1)

    # Layer 0: seed the carried activation from the input block.
    @pl.when(l == 0)
    def _():
        y_ref[...] = x_ref[...]

    x = y_ref[...]                              # (Bb, T, D) f32 running activation
    Bb, T, D = x.shape
    H = n_heads
    dh = D // H

    x2 = x.reshape(Bb * T, D)                   # flatten batch block into matmul M dim
    x_bf = x2.astype(jnp.bfloat16)

    # ---- fused QKV projection: one lane-dense matmul (scale folded in Wq) ---
    qkv = jnp.dot(x_bf, wqkv_ref[...],
                  preferred_element_type=jnp.float32) + bqkv_ref[...]   # (Bb*T, 3D)

    # ---- attention, streamed per (batch element, head) ----------------------
    # Only one (T, T) score/prob tile is live at a time (bounds VMEM on v7x).
    ctx_rows = []
    for b in range(Bb):
        q_b = qkv[b * T:(b + 1) * T, 0 * D:1 * D]       # (T, D)
        k_b = qkv[b * T:(b + 1) * T, 1 * D:2 * D]
        v_b = qkv[b * T:(b + 1) * T, 2 * D:3 * D]
        mask_b = mask_ref[b:b + 1, :]                   # (1, T): 0 valid, -1e9 padded

        attn_acc = jnp.zeros((T, T), jnp.float32)
        ctx_cols = []
        for h in range(H):
            q_h = q_b[:, h * dh:(h + 1) * dh].astype(jnp.bfloat16)   # (T, dh)
            k_h = k_b[:, h * dh:(h + 1) * dh].astype(jnp.bfloat16)
            v_h = v_b[:, h * dh:(h + 1) * dh].astype(jnp.bfloat16)

            s = jax.lax.dot_general(q_h, k_h, (((1,), (1,)), ((), ())),
                                    preferred_element_type=jnp.float32)  # (T, T)
            s = s + mask_b                                   # key-padding mask
            s = s - jnp.max(s, axis=-1, keepdims=True)
            p = jnp.exp(s)
            p = p * pl.reciprocal(jnp.sum(p, axis=-1, keepdims=True), approx=True)

            attn_acc = attn_acc + p
            ctx_cols.append(jnp.dot(p.astype(jnp.bfloat16), v_h,
                                    preferred_element_type=jnp.float32))  # (T, dh)

        # averaged-over-heads attention weights (PyTorch MHA default)
        attn_ref[b, :, :] = (attn_acc * (1.0 / H)).astype(attn_ref.dtype)
        ctx_rows.append(jnp.concatenate(ctx_cols, axis=-1))              # (T, D)

    ctx = jnp.concatenate(ctx_rows, axis=0) if Bb > 1 else ctx_rows[0]   # (Bb*T, D)

    # ---- output projection: single matmul, head reduction in MXU K dim ------
    attn_out = jnp.dot(ctx.astype(jnp.bfloat16), wo_ref[...],
                       preferred_element_type=jnp.float32) + bo_ref[...]  # (Bb*T, D)
    # TODO(synk): dropout omitted (eval mode / p=0 equivalence).

    def _ln(h, w, b, eps=1e-5):
        # one-pass LayerNorm: two reductions instead of three
        mu = jnp.mean(h, axis=-1, keepdims=True)
        m2 = jnp.mean(h * h, axis=-1, keepdims=True)
        var = m2 - mu * mu
        return (h - mu) * jax.lax.rsqrt(var + eps) * w + b

    h1 = _ln(x2 + attn_out, ln1w_ref[...], ln1b_ref[...])

    # ---- feed-forward + residual + LayerNorm2 (weights pre-transposed) ------
    f = jnp.dot(h1.astype(jnp.bfloat16), w1_ref[...],
                preferred_element_type=jnp.float32) + b1_ref[...]
    f = jnp.maximum(f, 0.0)
    f = jnp.dot(f.astype(jnp.bfloat16), w2_ref[...],
                preferred_element_type=jnp.float32) + b2_ref[...]
    out = _ln(h1 + f, ln2w_ref[...], ln2b_ref[...])

    y_ref[...] = out.reshape(Bb, T, D).astype(y_ref.dtype)


# -----------------------------------------------------------------------------
# Wrapper: single pallas_call, grid = (batch blocks, layers).
# -----------------------------------------------------------------------------
def fft_forward(x, lengths, params, n_heads, *, block_b=None,
                attn_dtype=jnp.float32):
    """x: (B, T, D) float32, lengths: (B,) int32, params: stacked dict from
    prepare_params().  Returns (x_out (B,T,D), alignments (B, L, T, T))."""
    B, T, D = x.shape
    L = params["wqkv"].shape[0]

    if block_b is None:
        block_b = 1
        for cand in (8, 4, 2, 1):               # largest divisor of B <= 8
            if B % cand == 0:
                block_b = cand
                break
    block_b = min(block_b, B)
    assert B % block_b == 0, "batch must be divisible by block_b"

    # additive key-padding mask: 0 for valid keys, -1e9 for padded keys
    ids = jnp.arange(T, dtype=lengths.dtype)
    pad = ids[None, :] >= lengths[:, None]                # True = padded
    mask_add = jnp.where(pad, jnp.float32(-1e9), jnp.float32(0.0))

    # generation-aware VMEM budget (v5e/v6e: 128 MiB, v7x: 64 MiB per TC)
    try:
        vmem_cap = int(pltpu.get_tpu_info().vmem_capacity_bytes)
    except Exception:
        vmem_cap = 64 * 1024 * 1024
    vmem_limit = min(vmem_cap * 3 // 4, 112 * 1024 * 1024)

    def wspec(arr):
        nd = arr.ndim  # layer-stacked weight: squeeze leading L dim, index by l
        return pl.BlockSpec((pl.Squeezed(),) + tuple(arr.shape[1:]),
                            lambda b, l, nd=nd: (l,) + (0,) * (nd - 1))

    weight_order = ("wqkv", "bqkv", "wo", "bo",
                    "ln1w", "ln1b", "ln2w", "ln2b", "w1", "b1", "w2", "b2")

    in_specs = [
        pl.BlockSpec((block_b, T, D), lambda b, l: (b, 0, 0)),   # x (resident over l)
        pl.BlockSpec((block_b, T), lambda b, l: (b, 0)),          # mask (resident over l)
    ] + [wspec(params[name]) for name in weight_order]

    out_specs = [
        # y: same block for every l  ->  stays in VMEM across layers (carry)
        pl.BlockSpec((block_b, T, D), lambda b, l: (b, 0, 0)),
        # per-layer attention map
        pl.BlockSpec((block_b, pl.Squeezed(), T, T), lambda b, l: (b, l, 0, 0)),
    ]

    kernel = functools.partial(_fft_kernel, n_heads=n_heads)
    y, attn = pl.pallas_call(
        kernel,
        out_shape=(
            jax.ShapeDtypeStruct((B, T, D), x.dtype),
            jax.ShapeDtypeStruct((B, L, T, T), attn_dtype),
        ),
        grid=(B // block_b, L),
        in_specs=in_specs,
        out_specs=out_specs,
        compiler_params=pltpu.CompilerParams(
            dimension_semantics=("parallel", "arbitrary"),
            vmem_limit_bytes=vmem_limit,
        ),
    )(x, mask_add, *[params[name] for name in weight_order])
    return y, attn


# -----------------------------------------------------------------------------
# One-time parameter transform: PyTorch layout -> kernel layout.
#   - wq/wk/wv transposed to (in, out), stacked into one (D, 3D) fused weight
#     (head-major column order), cast to bf16; 1/sqrt(dh) folded into the Q part
#   - out-proj transposed to (D, D) (rows in head-major ctx order)
#   - FFN weights transposed to (in, out)
#   - per-layer params stacked along a leading layer axis
# -----------------------------------------------------------------------------
def prepare_params(layer_params, n_heads):
    D = layer_params[0]["wq"].shape[0]
    F = layer_params[0]["w1"].shape[0]
    assert D % n_heads == 0
    dh = D // n_heads
    scale = 1.0 / math.sqrt(dh)

    keys = ("wqkv", "bqkv", "wo", "bo",
            "ln1w", "ln1b", "ln2w", "ln2b", "w1", "b1", "w2", "b2")
    acc = {k: [] for k in keys}
    for p in layer_params:
        wqkv = jnp.concatenate(
            [p["wq"].T * scale, p["wk"].T, p["wv"].T], axis=1)          # (D, 3D)
        bqkv = jnp.concatenate(
            [p["bq"] * scale, p["bk"], p["bv"]], axis=0).reshape(1, 3 * D)
        acc["wqkv"].append(wqkv.astype(jnp.bfloat16))
        acc["bqkv"].append(bqkv.astype(jnp.float32))
        acc["wo"].append(p["wo"].T.astype(jnp.bfloat16))                # (D, D)
        acc["bo"].append(p["bo"].reshape(1, D).astype(jnp.float32))
        acc["ln1w"].append(p["ln1w"].reshape(1, D).astype(jnp.float32))
        acc["ln1b"].append(p["ln1b"].reshape(1, D).astype(jnp.float32))
        acc["ln2w"].append(p["ln2w"].reshape(1, D).astype(jnp.float32))
        acc["ln2b"].append(p["ln2b"].reshape(1, D).astype(jnp.float32))
        acc["w1"].append(p["w1"].T.astype(jnp.bfloat16))                # (D, F)
        acc["b1"].append(p["b1"].reshape(1, F).astype(jnp.float32))
        acc["w2"].append(p["w2"].T.astype(jnp.bfloat16))                # (F, D)
        acc["b2"].append(p["b2"].reshape(1, D).astype(jnp.float32))
    return {k: jnp.stack(v, axis=0) for k, v in acc.items()}


# -----------------------------------------------------------------------------
# Deterministic PyTorch-layout parameter construction (synthetic).
# -----------------------------------------------------------------------------
def make_params(key, hidden_dim, ff_dim, n_layers):
    layers = []
    for _ in range(n_layers):
        key, *ks = jax.random.split(key, 7)
        s = 0.05
        layers.append(dict(
            wq=s * jax.random.normal(ks[0], (hidden_dim, hidden_dim), jnp.float32),
            wk=s * jax.random.normal(ks[1], (hidden_dim, hidden_dim), jnp.float32),
            wv=s * jax.random.normal(ks[2], (hidden_dim, hidden_dim), jnp.float32),
            bq=jnp.zeros((hidden_dim,), jnp.float32),
            bk=jnp.zeros((hidden_dim,), jnp.float32),
            bv=jnp.zeros((hidden_dim,), jnp.float32),
            wo=s * jax.random.normal(ks[3], (hidden_dim, hidden_dim), jnp.float32),
            bo=jnp.zeros((hidden_dim,), jnp.float32),
            ln1w=jnp.ones((hidden_dim,), jnp.float32),
            ln1b=jnp.zeros((hidden_dim,), jnp.float32),
            ln2w=jnp.ones((hidden_dim,), jnp.float32),
            ln2b=jnp.zeros((hidden_dim,), jnp.float32),
            w1=s * jax.random.normal(ks[4], (ff_dim, hidden_dim), jnp.float32),
            b1=jnp.zeros((ff_dim,), jnp.float32),
            w2=s * jax.random.normal(ks[5], (hidden_dim, ff_dim), jnp.float32),
            b2=jnp.zeros((hidden_dim,), jnp.float32),
        ))
    return layers


if __name__ == "__main__":
    # small shapes consistent with the module's forward
    B, T = 2, 16
    hidden_dim, n_heads, ff_dim, n_layers = 32, 4, 64, 2

    key = jax.random.PRNGKey(0)
    kx, kp = jax.random.split(key)
    x = jax.random.normal(kx, (B, T, hidden_dim), jnp.float32)
    lengths = jnp.array([T, 11], dtype=jnp.int32)

    torch_layout_params = make_params(kp, hidden_dim, ff_dim, n_layers)
    params = prepare_params(torch_layout_params, n_heads)

    y, aligns = fft_forward(x, lengths, params, n_heads)
    y = jax.block_until_ready(y)
    aligns = jax.block_until_ready(aligns)

    assert y.shape == (B, T, hidden_dim)
    assert aligns.shape == (B, n_layers, T, T)
    assert bool(jnp.all(jnp.isfinite(y)))
    assert bool(jnp.all(jnp.isfinite(aligns)))
    print("KERNEL_OK")
</pallas_src>

<mosaic_0001>
module attributes {stable_mosaic.version = 11 : i64} {
  func.func @_fft_kernel(%arg0: i32, %arg1: i32, %arg2: memref<2x16x32xf32, #tpu.memory_space<vmem>>, %arg3: memref<2x16xf32, #tpu.memory_space<vmem>>, %arg4: memref<1x32x96xbf16, #tpu.memory_space<vmem>>, %arg5: memref<1x1x96xf32, #tpu.memory_space<vmem>>, %arg6: memref<1x32x32xbf16, #tpu.memory_space<vmem>>, %arg7: memref<1x1x32xf32, #tpu.memory_space<vmem>>, %arg8: memref<1x1x32xf32, #tpu.memory_space<vmem>>, %arg9: memref<1x1x32xf32, #tpu.memory_space<vmem>>, %arg10: memref<1x1x32xf32, #tpu.memory_space<vmem>>, %arg11: memref<1x1x32xf32, #tpu.memory_space<vmem>>, %arg12: memref<1x32x64xbf16, #tpu.memory_space<vmem>>, %arg13: memref<1x1x64xf32, #tpu.memory_space<vmem>>, %arg14: memref<1x64x32xbf16, #tpu.memory_space<vmem>>, %arg15: memref<1x1x32xf32, #tpu.memory_space<vmem>>, %arg16: memref<2x16x32xf32, #tpu.memory_space<vmem>>, %arg17: memref<2x1x16x16xf32, #tpu.memory_space<vmem>>) attributes {dimension_semantics = [#tpu.dimension_semantics<parallel>, #tpu.dimension_semantics<arbitrary>], iteration_bounds = array<i64: 1, 2>, scalar_prefetch = 0 : i64, scratch_operands = 0 : i64, tpu.core_type = #tpu.core_type<tc>, window_params = [{transform_indices = @transform_0, window_bounds = array<i64: 2, 16, 32>}, {transform_indices = @transform_1, window_bounds = array<i64: 2, 16>}, {transform_indices = @transform_2, window_bounds = array<i64: 1, 32, 96>}, {transform_indices = @transform_3, window_bounds = array<i64: 1, 1, 96>}, {transform_indices = @transform_4, window_bounds = array<i64: 1, 32, 32>}, {transform_indices = @transform_5, window_bounds = array<i64: 1, 1, 32>}, {transform_indices = @transform_6, window_bounds = array<i64: 1, 1, 32>}, {transform_indices = @transform_7, window_bounds = array<i64: 1, 1, 32>}, {transform_indices = @transform_8, window_bounds = array<i64: 1, 1, 32>}, {transform_indices = @transform_9, window_bounds = array<i64: 1, 1, 32>}, {transform_indices = @transform_10, window_bounds = array<i64: 1, 32, 64>}, {transform_indices = @transform_11, window_bounds = array<i64: 1, 1, 64>}, {transform_indices = @transform_12, window_bounds = array<i64: 1, 64, 32>}, {transform_indices = @transform_13, window_bounds = array<i64: 1, 1, 32>}, {transform_indices = @transform_14, window_bounds = array<i64: 2, 16, 32>}, {transform_indices = @transform_15, window_bounds = array<i64: 2, 1, 16, 16>}]} {
    %c0_i32 = arith.constant 0 : i32
    %0 = arith.cmpi eq, %arg1, %c0_i32 : i32
    %1 = arith.extui %0 : i1 to i32
    %c0_i32_0 = arith.constant 0 : i32
    %2 = arith.cmpi ne, %1, %c0_i32_0 : i32
    scf.if %2 {
      %c0_103 = arith.constant 0 : index
      %c0_104 = arith.constant 0 : index
      %c0_105 = arith.constant 0 : index
      %294 = vector.load %arg2[%c0_103, %c0_104, %c0_105] : memref<2x16x32xf32, #tpu.memory_space<vmem>>, vector<2x16x32xf32>
      %c0_106 = arith.constant 0 : index
      %c0_107 = arith.constant 0 : index
      %c0_108 = arith.constant 0 : index
      %295 = vector.load %arg16[%c0_106, %c0_107, %c0_108] : memref<2x16x32xf32, #tpu.memory_space<vmem>>, vector<2x16x32xf32>
      tpu.vector_store %arg16[%c0_106, %c0_107, %c0_108], %294 {strides = array<i32>} : memref<2x16x32xf32, #tpu.memory_space<vmem>>, vector<2x16x32xf32>,
    } else {
    }
    %c0 = arith.constant 0 : index
    %c0_1 = arith.constant 0 : index
    %c0_2 = arith.constant 0 : index
    %3 = vector.load %arg16[%c0, %c0_1, %c0_2] : memref<2x16x32xf32, #tpu.memory_space<vmem>>, vector<2x16x32xf32>
    %4 = vector.shape_cast %3 : vector<2x16x32xf32> to vector<32x32xf32>
    %5 = arith.truncf %4 : vector<32x32xf32> to vector<32x32xbf16>
    %c0_3 = arith.constant 0 : index
    %c0_4 = arith.constant 0 : index
    %c0_5 = arith.constant 0 : index
    %6 = vector.load %arg4[%c0_3, %c0_4, %c0_5] : memref<1x32x96xbf16, #tpu.memory_space<vmem>>, vector<1x32x96xbf16>
    %7 = vector.shape_cast %6 : vector<1x32x96xbf16> to vector<32x96xbf16>
    %cst = arith.constant dense<0.000000e+00> : vector<32x96xf32>
    %8 = tpu.matmul %5, %7, %cst {dimension_numbers = #tpu.dot_dimension_numbers<[1], [0], [0], [1], [0, 0, 1, 1], [], []>} : vector<32x32xbf16>, vector<32x96xbf16>, vector<32x96xf32> -> vector<32x96xf32>
    %c0_6 = arith.constant 0 : index
    %c0_7 = arith.constant 0 : index
    %c0_8 = arith.constant 0 : index
    %9 = vector.load %arg5[%c0_6, %c0_7, %c0_8] : memref<1x1x96xf32, #tpu.memory_space<vmem>>, vector<1x1x96xf32>
    %10 = vector.shape_cast %9 : vector<1x1x96xf32> to vector<1x96xf32>
    %11 = vector.broadcast %10 : vector<1x96xf32> to vector<32x96xf32>
    %12 = arith.addf %8, %11 : vector<32x96xf32>
    %13 = vector.extract_strided_slice %12 {offsets = [0, 0], sizes = [16, 32], strides = [1, 1]} : vector<32x96xf32> to vector<16x32xf32>
    %14 = vector.extract_strided_slice %12 {offsets = [0, 32], sizes = [16, 32], strides = [1, 1]} : vector<32x96xf32> to vector<16x32xf32>
    %15 = vector.extract_strided_slice %12 {offsets = [0, 64], sizes = [16, 32], strides = [1, 1]} : vector<32x96xf32> to vector<16x32xf32>
    %c0_9 = arith.constant 0 : index
    %c0_10 = arith.constant 0 : index
    %16 = vector.load %arg3[%c0_9, %c0_10] : memref<2x16xf32, #tpu.memory_space<vmem>>, vector<1x16xf32>
    %cst_11 = arith.constant 0.000000e+00 : f32
    %17 = vector.broadcast %cst_11 : f32 to vector<16x16xf32>
    %18 = vector.extract_strided_slice %13 {offsets = [0, 0], sizes = [16, 8], strides = [1, 1]} : vector<16x32xf32> to vector<16x8xf32>
    %19 = arith.truncf %18 : vector<16x8xf32> to vector<16x8xbf16>
    %20 = vector.extract_strided_slice %14 {offsets = [0, 0], sizes = [16, 8], strides = [1, 1]} : vector<16x32xf32> to vector<16x8xf32>
    %21 = arith.truncf %20 : vector<16x8xf32> to vector<16x8xbf16>
    %22 = vector.extract_strided_slice %15 {offsets = [0, 0], sizes = [16, 8], strides = [1, 1]} : vector<16x32xf32> to vector<16x8xf32>
    %23 = arith.truncf %22 : vector<16x8xf32> to vector<16x8xbf16>
    %cst_12 = arith.constant dense<0.000000e+00> : vector<16x16xf32>
    %24 = tpu.matmul %19, %21, %cst_12 {dimension_numbers = #tpu.dot_dimension_numbers<[1], [1], [0], [0], [0, 0, 1, 0], [], []>} : vector<16x8xbf16>, vector<16x8xbf16>, vector<16x16xf32> -> vector<16x16xf32>
    %25 = vector.broadcast %16 : vector<1x16xf32> to vector<16x16xf32>
    %26 = arith.addf %24, %25 : vector<16x16xf32>
    %cst_13 = arith.constant dense<0xFF800000> : vector<16xf32>
    %27 = vector.multi_reduction <maximumf>, %26, %cst_13 [1] : vector<16x16xf32> to vector<16xf32>
    %28 = vector.shape_cast %27 : vector<16xf32> to vector<16x1xf32>
    %29 = vector.broadcast %28 : vector<16x1xf32> to vector<16x16xf32>
    %30 = arith.subf %26, %29 : vector<16x16xf32>
    %31 = math.exp %30 : vector<16x16xf32>
    %cst_14 = arith.constant dense<0.000000e+00> : vector<16xf32>
    %32 = vector.multi_reduction <add>, %31, %cst_14 [1] : vector<16x16xf32> to vector<16xf32>
    %33 = vector.shape_cast %32 : vector<16xf32> to vector<16x1xf32>
    %34 = tpu.reciprocal %33 {approx = true} : vector<16x1xf32> -> vector<16x1xf32>
    %35 = vector.broadcast %34 : vector<16x1xf32> to vector<16x16xf32>
    %36 = arith.mulf %31, %35 : vector<16x16xf32>
    %37 = arith.addf %17, %36 : vector<16x16xf32>
    %38 = arith.truncf %36 : vector<16x16xf32> to vector<16x16xbf16>
    %cst_15 = arith.constant dense<0.000000e+00> : vector<16x8xf32>
    %39 = tpu.matmul %38, %23, %cst_15 {dimension_numbers = #tpu.dot_dimension_numbers<[1], [0], [0], [1], [0, 0, 1, 1], [], []>} : vector<16x16xbf16>, vector<16x8xbf16>, vector<16x8xf32> -> vector<16x8xf32>
    %40 = vector.extract_strided_slice %13 {offsets = [0, 8], sizes = [16, 8], strides = [1, 1]} : vector<16x32xf32> to vector<16x8xf32>
    %41 = arith.truncf %40 : vector<16x8xf32> to vector<16x8xbf16>
    %42 = vector.extract_strided_slice %14 {offsets = [0, 8], sizes = [16, 8], strides = [1, 1]} : vector<16x32xf32> to vector<16x8xf32>
    %43 = arith.truncf %42 : vector<16x8xf32> to vector<16x8xbf16>
    %44 = vector.extract_strided_slice %15 {offsets = [0, 8], sizes = [16, 8], strides = [1, 1]} : vector<16x32xf32> to vector<16x8xf32>
    %45 = arith.truncf %44 : vector<16x8xf32> to vector<16x8xbf16>
    %cst_16 = arith.constant dense<0.000000e+00> : vector<16x16xf32>
    %46 = tpu.matmul %41, %43, %cst_16 {dimension_numbers = #tpu.dot_dimension_numbers<[1], [1], [0], [0], [0, 0, 1, 0], [], []>} : vector<16x8xbf16>, vector<16x8xbf16>, vector<16x16xf32> -> vector<16x16xf32>
    %47 = vector.broadcast %16 : vector<1x16xf32> to vector<16x16xf32>
    %48 = arith.addf %46, %47 : vector<16x16xf32>
    %cst_17 = arith.constant dense<0xFF800000> : vector<16xf32>
    %49 = vector.multi_reduction <maximumf>, %48, %cst_17 [1] : vector<16x16xf32> to vector<16xf32>
    %50 = vector.shape_cast %49 : vector<16xf32> to vector<16x1xf32>
    %51 = vector.broadcast %50 : vector<16x1xf32> to vector<16x16xf32>
    %52 = arith.subf %48, %51 : vector<16x16xf32>
    %53 = math.exp %52 : vector<16x16xf32>
    %cst_18 = arith.constant dense<0.000000e+00> : vector<16xf32>
    %54 = vector.multi_reduction <add>, %53, %cst_18 [1] : vector<16x16xf32> to vector<16xf32>
    %55 = vector.shape_cast %54 : vector<16xf32> to vector<16x1xf32>
    %56 = tpu.reciprocal %55 {approx = true} : vector<16x1xf32> -> vector<16x1xf32>
    %57 = vector.broadcast %56 : vector<16x1xf32> to vector<16x16xf32>
    %58 = arith.mulf %53, %57 : vector<16x16xf32>
    %59 = arith.addf %37, %58 : vector<16x16xf32>
    %60 = arith.truncf %58 : vector<16x16xf32> to vector<16x16xbf16>
    %cst_19 = arith.constant dense<0.000000e+00> : vector<16x8xf32>
    %61 = tpu.matmul %60, %45, %cst_19 {dimension_numbers = #tpu.dot_dimension_numbers<[1], [0], [0], [1], [0, 0, 1, 1], [], []>} : vector<16x16xbf16>, vector<16x8xbf16>, vector<16x8xf32> -> vector<16x8xf32>
    %62 = vector.extract_strided_slice %13 {offsets = [0, 16], sizes = [16, 8], strides = [1, 1]} : vector<16x32xf32> to vector<16x8xf32>
    %63 = arith.truncf %62 : vector<16x8xf32> to vector<16x8xbf16>
    %64 = vector.extract_strided_slice %14 {offsets = [0, 16], sizes = [16, 8], strides = [1, 1]} : vector<16x32xf32> to vector<16x8xf32>
    %65 = arith.truncf %64 : vector<16x8xf32> to vector<16x8xbf16>
    %66 = vector.extract_strided_slice %15 {offsets = [0, 16], sizes = [16, 8], strides = [1, 1]} : vector<16x32xf32> to vector<16x8xf32>
    %67 = arith.truncf %66 : vector<16x8xf32> to vector<16x8xbf16>
    %cst_20 = arith.constant dense<0.000000e+00> : vector<16x16xf32>
    %68 = tpu.matmul %63, %65, %cst_20 {dimension_numbers = #tpu.dot_dimension_numbers<[1], [1], [0], [0], [0, 0, 1, 0], [], []>} : vector<16x8xbf16>, vector<16x8xbf16>, vector<16x16xf32> -> vector<16x16xf32>
    %69 = vector.broadcast %16 : vector<1x16xf32> to vector<16x16xf32>
    %70 = arith.addf %68, %69 : vector<16x16xf32>
    %cst_21 = arith.constant dense<0xFF800000> : vector<16xf32>
    %71 = vector.multi_reduction <maximumf>, %70, %cst_21 [1] : vector<16x16xf32> to vector<16xf32>
    %72 = vector.shape_cast %71 : vector<16xf32> to vector<16x1xf32>
    %73 = vector.broadcast %72 : vector<16x1xf32> to vector<16x16xf32>
    %74 = arith.subf %70, %73 : vector<16x16xf32>
    %75 = math.exp %74 : vector<16x16xf32>
    %cst_22 = arith.constant dense<0.000000e+00> : vector<16xf32>
    %76 = vector.multi_reduction <add>, %75, %cst_22 [1] : vector<16x16xf32> to vector<16xf32>
    %77 = vector.shape_cast %76 : vector<16xf32> to vector<16x1xf32>
    %78 = tpu.reciprocal %77 {approx = true} : vector<16x1xf32> -> vector<16x1xf32>
    %79 = vector.broadcast %78 : vector<16x1xf32> to vector<16x16xf32>
    %80 = arith.mulf %75, %79 : vector<16x16xf32>
    %81 = arith.addf %59, %80 : vector<16x16xf32>
    %82 = arith.truncf %80 : vector<16x16xf32> to vector<16x16xbf16>
    %cst_23 = arith.constant dense<0.000000e+00> : vector<16x8xf32>
    %83 = tpu.matmul %82, %67, %cst_23 {dimension_numbers = #tpu.dot_dimension_numbers<[1], [0], [0], [1], [0, 0, 1, 1], [], []>} : vector<16x16xbf16>, vector<16x8xbf16>, vector<16x8xf32> -> vector<16x8xf32>
    %84 = vector.extract_strided_slice %13 {offsets = [0, 24], sizes = [16, 8], strides = [1, 1]} : vector<16x32xf32> to vector<16x8xf32>
    %85 = arith.truncf %84 : vector<16x8xf32> to vector<16x8xbf16>
    %86 = vector.extract_strided_slice %14 {offsets = [0, 24], sizes = [16, 8], strides = [1, 1]} : vector<16x32xf32> to vector<16x8xf32>
    %87 = arith.truncf %86 : vector<16x8xf32> to vector<16x8xbf16>
    %88 = vector.extract_strided_slice %15 {offsets = [0, 24], sizes = [16, 8], strides = [1, 1]} : vector<16x32xf32> to vector<16x8xf32>
    %89 = arith.truncf %88 : vector<16x8xf32> to vector<16x8xbf16>
    %cst_24 = arith.constant dense<0.000000e+00> : vector<16x16xf32>
    %90 = tpu.matmul %85, %87, %cst_24 {dimension_numbers = #tpu.dot_dimension_numbers<[1], [1], [0], [0], [0, 0, 1, 0], [], []>} : vector<16x8xbf16>, vector<16x8xbf16>, vector<16x16xf32> -> vector<16x16xf32>
    %91 = vector.broadcast %16 : vector<1x16xf32> to vector<16x16xf32>
    %92 = arith.addf %90, %91 : vector<16x16xf32>
    %cst_25 = arith.constant dense<0xFF800000> : vector<16xf32>
    %93 = vector.multi_reduction <maximumf>, %92, %cst_25 [1] : vector<16x16xf32> to vector<16xf32>
    %94 = vector.shape_cast %93 : vector<16xf32> to vector<16x1xf32>
    %95 = vector.broadcast %94 : vector<16x1xf32> to vector<16x16xf32>
    %96 = arith.subf %92, %95 : vector<16x16xf32>
    %97 = math.exp %96 : vector<16x16xf32>
    %cst_26 = arith.constant dense<0.000000e+00> : vector<16xf32>
    %98 = vector.multi_reduction <add>, %97, %cst_26 [1] : vector<16x16xf32> to vector<16xf32>
    %99 = vector.shape_cast %98 : vector<16xf32> to vector<16x1xf32>
    %100 = tpu.reciprocal %99 {approx = true} : vector<16x1xf32> -> vector<16x1xf32>
    %101 = vector.broadcast %100 : vector<16x1xf32> to vector<16x16xf32>
    %102 = arith.mulf %97, %101 : vector<16x16xf32>
    %103 = arith.addf %81, %102 : vector<16x16xf32>
    %104 = arith.truncf %102 : vector<16x16xf32> to vector<16x16xbf16>
    %cst_27 = arith.constant dense<0.000000e+00> : vector<16x8xf32>
    %105 = tpu.matmul %104, %89, %cst_27 {dimension_numbers = #tpu.dot_dimension_numbers<[1], [0], [0], [1], [0, 0, 1, 1], [], []>} : vector<16x16xbf16>, vector<16x8xbf16>, vector<16x8xf32> -> vector<16x8xf32>
    %cst_28 = arith.constant 2.500000e-01 : f32
    %106 = vector.broadcast %cst_28 : f32 to vector<16x16xf32>
    %107 = arith.mulf %103, %106 : vector<16x16xf32>
    %c0_29 = arith.constant 0 : index
    %c0_30 = arith.constant 0 : index
    %c0_31 = arith.constant 0 : index
    %c0_32 = arith.constant 0 : index
    %108 = vector.load %arg17[%c0_29, %c0_30, %c0_31, %c0_32] : memref<2x1x16x16xf32, #tpu.memory_space<vmem>>, vector<1x1x16x16xf32>
    %109 = vector.shape_cast %108 : vector<1x1x16x16xf32> to vector<16x16xf32>
    %110 = vector.shape_cast %107 : vector<16x16xf32> to vector<1x1x16x16xf32>
    tpu.vector_store %arg17[%c0_29, %c0_30, %c0_31, %c0_32], %110 {strides = array<i32>} : memref<2x1x16x16xf32, #tpu.memory_space<vmem>>, vector<1x1x16x16xf32>,
    %111 = tpu.concatenate %39, %61, %83, %105 in 1 : vector<16x8xf32>, vector<16x8xf32>, vector<16x8xf32>, vector<16x8xf32> -> vector<16x32xf32>
    %112 = vector.extract_strided_slice %12 {offsets = [16, 0], sizes = [16, 32], strides = [1, 1]} : vector<32x96xf32> to vector<16x32xf32>
    %113 = vector.extract_strided_slice %12 {offsets = [16, 32], sizes = [16, 32], strides = [1, 1]} : vector<32x96xf32> to vector<16x32xf32>
    %114 = vector.extract_strided_slice %12 {offsets = [16, 64], sizes = [16, 32], strides = [1, 1]} : vector<32x96xf32> to vector<16x32xf32>
    %c1 = arith.constant 1 : index
    %c0_33 = arith.constant 0 : index
    %115 = vector.load %arg3[%c1, %c0_33] : memref<2x16xf32, #tpu.memory_space<vmem>>, vector<1x16xf32>
    %cst_34 = arith.constant 0.000000e+00 : f32
    %116 = vector.broadcast %cst_34 : f32 to vector<16x16xf32>
    %117 = vector.extract_strided_slice %112 {offsets = [0, 0], sizes = [16, 8], strides = [1, 1]} : vector<16x32xf32> to vector<16x8xf32>
    %118 = arith.truncf %117 : vector<16x8xf32> to vector<16x8xbf16>
    %119 = vector.extract_strided_slice %113 {offsets = [0, 0], sizes = [16, 8], strides = [1, 1]} : vector<16x32xf32> to vector<16x8xf32>
    %120 = arith.truncf %119 : vector<16x8xf32> to vector<16x8xbf16>
    %121 = vector.extract_strided_slice %114 {offsets = [0, 0], sizes = [16, 8], strides = [1, 1]} : vector<16x32xf32> to vector<16x8xf32>
    %122 = arith.truncf %121 : vector<16x8xf32> to vector<16x8xbf16>
    %cst_35 = arith.constant dense<0.000000e+00> : vector<16x16xf32>
    %123 = tpu.matmul %118, %120, %cst_35 {dimension_numbers = #tpu.dot_dimension_numbers<[1], [1], [0], [0], [0, 0, 1, 0], [], []>} : vector<16x8xbf16>, vector<16x8xbf16>, vector<16x16xf32> -> vector<16x16xf32>
    %124 = vector.broadcast %115 : vector<1x16xf32> to vector<16x16xf32>
    %125 = arith.addf %123, %124 : vector<16x16xf32>
    %cst_36 = arith.constant dense<0xFF800000> : vector<16xf32>
    %126 = vector.multi_reduction <maximumf>, %125, %cst_36 [1] : vector<16x16xf32> to vector<16xf32>
    %127 = vector.shape_cast %126 : vector<16xf32> to vector<16x1xf32>
    %128 = vector.broadcast %127 : vector<16x1xf32> to vector<16x16xf32>
    %129 = arith.subf %125, %128 : vector<16x16xf32>
    %130 = math.exp %129 : vector<16x16xf32>
    %cst_37 = arith.constant dense<0.000000e+00> : vector<16xf32>
    %131 = vector.multi_reduction <add>, %130, %cst_37 [1] : vector<16x16xf32> to vector<16xf32>
    %132 = vector.shape_cast %131 : vector<16xf32> to vector<16x1xf32>
    %133 = tpu.reciprocal %132 {approx = true} : vector<16x1xf32> -> vector<16x1xf32>
    %134 = vector.broadcast %133 : vector<16x1xf32> to vector<16x16xf32>
    %135 = arith.mulf %130, %134 : vector<16x16xf32>
    %136 = arith.addf %116, %135 : vector<16x16xf32>
    %137 = arith.truncf %135 : vector<16x16xf32> to vector<16x16xbf16>
    %cst_38 = arith.constant dense<0.000000e+00> : vector<16x8xf32>
    %138 = tpu.matmul %137, %122, %cst_38 {dimension_numbers = #tpu.dot_dimension_numbers<[1], [0], [0], [1], [0, 0, 1, 1], [], []>} : vector<16x16xbf16>, vector<16x8xbf16>, vector<16x8xf32> -> vector<16x8xf32>
    %139 = vector.extract_strided_slice %112 {offsets = [0, 8], sizes = [16, 8], strides = [1, 1]} : vector<16x32xf32> to vector<16x8xf32>
    %140 = arith.truncf %139 : vector<16x8xf32> to vector<16x8xbf16>
    %141 = vector.extract_strided_slice %113 {offsets = [0, 8], sizes = [16, 8], strides = [1, 1]} : vector<16x32xf32> to vector<16x8xf32>
    %142 = arith.truncf %141 : vector<16x8xf32> to vector<16x8xbf16>
    %143 = vector.extract_strided_slice %114 {offsets = [0, 8], sizes = [16, 8], strides = [1, 1]} : vector<16x32xf32> to vector<16x8xf32>
    %144 = arith.truncf %143 : vector<16x8xf32> to vector<16x8xbf16>
    %cst_39 = arith.constant dense<0.000000e+00> : vector<16x16xf32>
    %145 = tpu.matmul %140, %142, %cst_39 {dimension_numbers = #tpu.dot_dimension_numbers<[1], [1], [0], [0], [0, 0, 1, 0], [], []>} : vector<16x8xbf16>, vector<16x8xbf16>, vector<16x16xf32> -> vector<16x16xf32>
    %146 = vector.broadcast %115 : vector<1x16xf32> to vector<16x16xf32>
    %147 = arith.addf %145, %146 : vector<16x16xf32>
    %cst_40 = arith.constant dense<0xFF800000> : vector<16xf32>
    %148 = vector.multi_reduction <maximumf>, %147, %cst_40 [1] : vector<16x16xf32> to vector<16xf32>
    %149 = vector.shape_cast %148 : vector<16xf32> to vector<16x1xf32>
    %150 = vector.broadcast %149 : vector<16x1xf32> to vector<16x16xf32>
    %151 = arith.subf %147, %150 : vector<16x16xf32>
    %152 = math.exp %151 : vector<16x16xf32>
    %cst_41 = arith.constant dense<0.000000e+00> : vector<16xf32>
    %153 = vector.multi_reduction <add>, %152, %cst_41 [1] : vector<16x16xf32> to vector<16xf32>
    %154 = vector.shape_cast %153 : vector<16xf32> to vector<16x1xf32>
    %155 = tpu.reciprocal %154 {approx = true} : vector<16x1xf32> -> vector<16x1xf32>
    %156 = vector.broadcast %155 : vector<16x1xf32> to vector<16x16xf32>
    %157 = arith.mulf %152, %156 : vector<16x16xf32>
    %158 = arith.addf %136, %157 : vector<16x16xf32>
    %159 = arith.truncf %157 : vector<16x16xf32> to vector<16x16xbf16>
    %cst_42 = arith.constant dense<0.000000e+00> : vector<16x8xf32>
    %160 = tpu.matmul %159, %144, %cst_42 {dimension_numbers = #tpu.dot_dimension_numbers<[1], [0], [0], [1], [0, 0, 1, 1], [], []>} : vector<16x16xbf16>, vector<16x8xbf16>, vector<16x8xf32> -> vector<16x8xf32>
    %161 = vector.extract_strided_slice %112 {offsets = [0, 16], sizes = [16, 8], strides = [1, 1]} : vector<16x32xf32> to vector<16x8xf32>
    %162 = arith.truncf %161 : vector<16x8xf32> to vector<16x8xbf16>
    %163 = vector.extract_strided_slice %113 {offsets = [0, 16], sizes = [16, 8], strides = [1, 1]} : vector<16x32xf32> to vector<16x8xf32>
    %164 = arith.truncf %163 : vector<16x8xf32> to vector<16x8xbf16>
    %165 = vector.extract_strided_slice %114 {offsets = [0, 16], sizes = [16, 8], strides = [1, 1]} : vector<16x32xf32> to vector<16x8xf32>
    %166 = arith.truncf %165 : vector<16x8xf32> to vector<16x8xbf16>
    %cst_43 = arith.constant dense<0.000000e+00> : vector<16x16xf32>
    %167 = tpu.matmul %162, %164, %cst_43 {dimension_numbers = #tpu.dot_dimension_numbers<[1], [1], [0], [0], [0, 0, 1, 0], [], []>} : vector<16x8xbf16>, vector<16x8xbf16>, vector<16x16xf32> -> vector<16x16xf32>
    %168 = vector.broadcast %115 : vector<1x16xf32> to vector<16x16xf32>
    %169 = arith.addf %167, %168 : vector<16x16xf32>
    %cst_44 = arith.constant dense<0xFF800000> : vector<16xf32>
    %170 = vector.multi_reduction <maximumf>, %169, %cst_44 [1] : vector<16x16xf32> to vector<16xf32>
    %171 = vector.shape_cast %170 : vector<16xf32> to vector<16x1xf32>
    %172 = vector.broadcast %171 : vector<16x1xf32> to vector<16x16xf32>
    %173 = arith.subf %169, %172 : vector<16x16xf32>
    %174 = math.exp %173 : vector<16x16xf32>
    %cst_45 = arith.constant dense<0.000000e+00> : vector<16xf32>
    %175 = vector.multi_reduction <add>, %174, %cst_45 [1] : vector<16x16xf32> to vector<16xf32>
    %176 = vector.shape_cast %175 : vector<16xf32> to vector<16x1xf32>
    %177 = tpu.reciprocal %176 {approx = true} : vector<16x1xf32> -> vector<16x1xf32>
    %178 = vector.broadcast %177 : vector<16x1xf32> to vector<16x16xf32>
    %179 = arith.mulf %174, %178 : vector<16x16xf32>
    %180 = arith.addf %158, %179 : vector<16x16xf32>
    %181 = arith.truncf %179 : vector<16x16xf32> to vector<16x16xbf16>
    %cst_46 = arith.constant dense<0.000000e+00> : vector<16x8xf32>
    %182 = tpu.matmul %181, %166, %cst_46 {dimension_numbers = #tpu.dot_dimension_numbers<[1], [0], [0], [1], [0, 0, 1, 1], [], []>} : vector<16x16xbf16>, vector<16x8xbf16>, vector<16x8xf32> -> vector<16x8xf32>
    %183 = vector.extract_strided_slice %112 {offsets = [0, 24], sizes = [16, 8], strides = [1, 1]} : vector<16x32xf32> to vector<16x8xf32>
    %184 = arith.truncf %183 : vector<16x8xf32> to vector<16x8xbf16>
    %185 = vector.extract_strided_slice %113 {offsets = [0, 24], sizes = [16, 8], strides = [1, 1]} : vector<16x32xf32> to vector<16x8xf32>
    %186 = arith.truncf %185 : vector<16x8xf32> to vector<16x8xbf16>
    %187 = vector.extract_strided_slice %114 {offsets = [0, 24], sizes = [16, 8], strides = [1, 1]} : vector<16x32xf32> to vector<16x8xf32>
    %188 = arith.truncf %187 : vector<16x8xf32> to vector<16x8xbf16>
    %cst_47 = arith.constant dense<0.000000e+00> : vector<16x16xf32>
    %189 = tpu.matmul %184, %186, %cst_47 {dimension_numbers = #tpu.dot_dimension_numbers<[1], [1], [0], [0], [0, 0, 1, 0], [], []>} : vector<16x8xbf16>, vector<16x8xbf16>, vector<16x16xf32> -> vector<16x16xf32>
    %190 = vector.broadcast %115 : vector<1x16xf32> to vector<16x16xf32>
    %191 = arith.addf %189, %190 : vector<16x16xf32>
    %cst_48 = arith.constant dense<0xFF800000> : vector<16xf32>
    %192 = vector.multi_reduction <maximumf>, %191, %cst_48 [1] : vector<16x16xf32> to vector<16xf32>
    %193 = vector.shape_cast %192 : vector<16xf32> to vector<16x1xf32>
    %194 = vector.broadcast %193 : vector<16x1xf32> to vector<16x16xf32>
    %195 = arith.subf %191, %194 : vector<16x16xf32>
    %196 = math.exp %195 : vector<16x16xf32>
    %cst_49 = arith.constant dense<0.000000e+00> : vector<16xf32>
    %197 = vector.multi_reduction <add>, %196, %cst_49 [1] : vector<16x16xf32> to vector<16xf32>
    %198 = vector.shape_cast %197 : vector<16xf32> to vector<16x1xf32>
    %199 = tpu.reciprocal %198 {approx = true} : vector<16x1xf32> -> vector<16x1xf32>
    %200 = vector.broadcast %199 : vector<16x1xf32> to vector<16x16xf32>
    %201 = arith.mulf %196, %200 : vector<16x16xf32>
    %202 = arith.addf %180, %201 : vector<16x16xf32>
    %203 = arith.truncf %201 : vector<16x16xf32> to vector<16x16xbf16>
    %cst_50 = arith.constant dense<0.000000e+00> : vector<16x8xf32>
    %204 = tpu.matmul %203, %188, %cst_50 {dimension_numbers = #tpu.dot_dimension_numbers<[1], [0], [0], [1], [0, 0, 1, 1], [], []>} : vector<16x16xbf16>, vector<16x8xbf16>, vector<16x8xf32> -> vector<16x8xf32>
    %cst_51 = arith.constant 2.500000e-01 : f32
    %205 = vector.broadcast %cst_51 : f32 to vector<16x16xf32>
    %206 = arith.mulf %202, %205 : vector<16x16xf32>
    %c1_52 = arith.constant 1 : index
    %c0_53 = arith.constant 0 : index
    %c0_54 = arith.constant 0 : index
    %c0_55 = arith.constant 0 : index
    %207 = vector.load %arg17[%c1_52, %c0_53, %c0_54, %c0_55] : memref<2x1x16x16xf32, #tpu.memory_space<vmem>>, vector<1x1x16x16xf32>
    %208 = vector.shape_cast %207 : vector<1x1x16x16xf32> to vector<16x16xf32>
    %209 = vector.shape_cast %206 : vector<16x16xf32> to vector<1x1x16x16xf32>
    tpu.vector_store %arg17[%c1_52, %c0_53, %c0_54, %c0_55], %209 {strides = array<i32>} : memref<2x1x16x16xf32, #tpu.memory_space<vmem>>, vector<1x1x16x16xf32>,
    %210 = tpu.concatenate %138, %160, %182, %204 in 1 : vector<16x8xf32>, vector<16x8xf32>, vector<16x8xf32>, vector<16x8xf32> -> vector<16x32xf32>
    %211 = tpu.concatenate %111, %210 in 0 : vector<16x32xf32>, vector<16x32xf32> -> vector<32x32xf32>
    %212 = arith.truncf %211 : vector<32x32xf32> to vector<32x32xbf16>
    %c0_56 = arith.constant 0 : index
    %c0_57 = arith.constant 0 : index
    %c0_58 = arith.constant 0 : index
    %213 = vector.load %arg6[%c0_56, %c0_57, %c0_58] : memref<1x32x32xbf16, #tpu.memory_space<vmem>>, vector<1x32x32xbf16>
    %214 = vector.shape_cast %213 : vector<1x32x32xbf16> to vector<32x32xbf16>
    %cst_59 = arith.constant dense<0.000000e+00> : vector<32x32xf32>
    %215 = tpu.matmul %212, %214, %cst_59 {dimension_numbers = #tpu.dot_dimension_numbers<[1], [0], [0], [1], [0, 0, 1, 1], [], []>} : vector<32x32xbf16>, vector<32x32xbf16>, vector<32x32xf32> -> vector<32x32xf32>
    %c0_60 = arith.constant 0 : index
    %c0_61 = arith.constant 0 : index
    %c0_62 = arith.constant 0 : index
    %216 = vector.load %arg7[%c0_60, %c0_61, %c0_62] : memref<1x1x32xf32, #tpu.memory_space<vmem>>, vector<1x1x32xf32>
    %217 = vector.shape_cast %216 : vector<1x1x32xf32> to vector<1x32xf32>
    %218 = vector.broadcast %217 : vector<1x32xf32> to vector<32x32xf32>
    %219 = arith.addf %215, %218 : vector<32x32xf32>
    %220 = arith.addf %4, %219 : vector<32x32xf32>
    %c0_63 = arith.constant 0 : index
    %c0_64 = arith.constant 0 : index
    %c0_65 = arith.constant 0 : index
    %221 = vector.load %arg8[%c0_63, %c0_64, %c0_65] : memref<1x1x32xf32, #tpu.memory_space<vmem>>, vector<1x1x32xf32>
    %222 = vector.shape_cast %221 : vector<1x1x32xf32> to vector<1x32xf32>
    %c0_66 = arith.constant 0 : index
    %c0_67 = arith.constant 0 : index
    %c0_68 = arith.constant 0 : index
    %223 = vector.load %arg9[%c0_66, %c0_67, %c0_68] : memref<1x1x32xf32, #tpu.memory_space<vmem>>, vector<1x1x32xf32>
    %224 = vector.shape_cast %223 : vector<1x1x32xf32> to vector<1x32xf32>
    %cst_69 = arith.constant dense<0.000000e+00> : vector<32xf32>
    %225 = vector.multi_reduction <add>, %220, %cst_69 [1] : vector<32x32xf32> to vector<32xf32>
    %226 = vector.shape_cast %225 : vector<32xf32> to vector<32x1xf32>
    %cst_70 = arith.constant 3.200000e+01 : f32
    %227 = vector.broadcast %cst_70 : f32 to vector<32x1xf32>
    %228 = arith.divf %226, %227 : vector<32x1xf32>
    %229 = arith.mulf %220, %220 : vector<32x32xf32>
    %cst_71 = arith.constant dense<0.000000e+00> : vector<32xf32>
    %230 = vector.multi_reduction <add>, %229, %cst_71 [1] : vector<32x32xf32> to vector<32xf32>
    %231 = vector.shape_cast %230 : vector<32xf32> to vector<32x1xf32>
    %cst_72 = arith.constant 3.200000e+01 : f32
    %232 = vector.broadcast %cst_72 : f32 to vector<32x1xf32>
    %233 = arith.divf %231, %232 : vector<32x1xf32>
    %234 = arith.mulf %228, %228 : vector<32x1xf32>
    %235 = arith.subf %233, %234 : vector<32x1xf32>
    %236 = vector.broadcast %228 : vector<32x1xf32> to vector<32x32xf32>
    %237 = arith.subf %220, %236 : vector<32x32xf32>
    %cst_73 = arith.constant 9.99999974E-6 : f32
    %238 = vector.broadcast %cst_73 : f32 to vector<32x1xf32>
    %239 = arith.addf %235, %238 : vector<32x1xf32>
    %240 = math.rsqrt %239 : vector<32x1xf32>
    %241 = vector.broadcast %240 : vector<32x1xf32> to vector<32x32xf32>
    %242 = arith.mulf %237, %241 : vector<32x32xf32>
    %243 = vector.broadcast %222 : vector<1x32xf32> to vector<32x32xf32>
    %244 = arith.mulf %242, %243 : vector<32x32xf32>
    %245 = vector.broadcast %224 : vector<1x32xf32> to vector<32x32xf32>
    %246 = arith.addf %244, %245 : vector<32x32xf32>
    %247 = arith.truncf %246 : vector<32x32xf32> to vector<32x32xbf16>
    %c0_74 = arith.constant 0 : index
    %c0_75 = arith.constant 0 : index
    %c0_76 = arith.constant 0 : index
    %248 = vector.load %arg12[%c0_74, %c0_75, %c0_76] : memref<1x32x64xbf16, #tpu.memory_space<vmem>>, vector<1x32x64xbf16>
    %249 = vector.shape_cast %248 : vector<1x32x64xbf16> to vector<32x64xbf16>
    %cst_77 = arith.constant dense<0.000000e+00> : vector<32x64xf32>
    %250 = tpu.matmul %247, %249, %cst_77 {dimension_numbers = #tpu.dot_dimension_numbers<[1], [0], [0], [1], [0, 0, 1, 1], [], []>} : vector<32x32xbf16>, vector<32x64xbf16>, vector<32x64xf32> -> vector<32x64xf32>
    %c0_78 = arith.constant 0 : index
    %c0_79 = arith.constant 0 : index
    %c0_80 = arith.constant 0 : index
    %251 = vector.load %arg13[%c0_78, %c0_79, %c0_80] : memref<1x1x64xf32, #tpu.memory_space<vmem>>, vector<1x1x64xf32>
    %252 = vector.shape_cast %251 : vector<1x1x64xf32> to vector<1x64xf32>
    %253 = vector.broadcast %252 : vector<1x64xf32> to vector<32x64xf32>
    %254 = arith.addf %250, %253 : vector<32x64xf32>
    %cst_81 = arith.constant 0.000000e+00 : f32
    %255 = vector.broadcast %cst_81 : f32 to vector<32x64xf32>
    %256 = arith.maximumf %254, %255 : vector<32x64xf32>
    %257 = arith.truncf %256 : vector<32x64xf32> to vector<32x64xbf16>
    %c0_82 = arith.constant 0 : index
    %c0_83 = arith.constant 0 : index
    %c0_84 = arith.constant 0 : index
    %258 = vector.load %arg14[%c0_82, %c0_83, %c0_84] : memref<1x64x32xbf16, #tpu.memory_space<vmem>>, vector<1x64x32xbf16>
    %259 = vector.shape_cast %258 : vector<1x64x32xbf16> to vector<64x32xbf16>
    %cst_85 = arith.constant dense<0.000000e+00> : vector<32x32xf32>
    %260 = tpu.matmul %257, %259, %cst_85 {dimension_numbers = #tpu.dot_dimension_numbers<[1], [0], [0], [1], [0, 0, 1, 1], [], []>} : vector<32x64xbf16>, vector<64x32xbf16>, vector<32x32xf32> -> vector<32x32xf32>
    %c0_86 = arith.constant 0 : index
    %c0_87 = arith.constant 0 : index
    %c0_88 = arith.constant 0 : index
    %261 = vector.load %arg15[%c0_86, %c0_87, %c0_88] : memref<1x1x32xf32, #tpu.memory_space<vmem>>, vector<1x1x32xf32>
    %262 = vector.shape_cast %261 : vector<1x1x32xf32> to vector<1x32xf32>
    %263 = vector.broadcast %262 : vector<1x32xf32> to vector<32x32xf32>
    %264 = arith.addf %260, %263 : vector<32x32xf32>
    %265 = arith.addf %246, %264 : vector<32x32xf32>
    %c0_89 = arith.constant 0 : index
    %c0_90 = arith.constant 0 : index
    %c0_91 = arith.constant 0 : index
    %266 = vector.load %arg10[%c0_89, %c0_90, %c0_91] : memref<1x1x32xf32, #tpu.memory_space<vmem>>, vector<1x1x32xf32>
    %267 = vector.shape_cast %266 : vector<1x1x32xf32> to vector<1x32xf32>
    %c0_92 = arith.constant 0 : index
    %c0_93 = arith.constant 0 : index
    %c0_94 = arith.constant 0 : index
    %268 = vector.load %arg11[%c0_92, %c0_93, %c0_94] : memref<1x1x32xf32, #tpu.memory_space<vmem>>, vector<1x1x32xf32>
    %269 = vector.shape_cast %268 : vector<1x1x32xf32> to vector<1x32xf32>
    %cst_95 = arith.constant dense<0.000000e+00> : vector<32xf32>
    %270 = vector.multi_reduction <add>, %265, %cst_95 [1] : vector<32x32xf32> to vector<32xf32>
    %271 = vector.shape_cast %270 : vector<32xf32> to vector<32x1xf32>
    %cst_96 = arith.constant 3.200000e+01 : f32
    %272 = vector.broadcast %cst_96 : f32 to vector<32x1xf32>
    %273 = arith.divf %271, %272 : vector<32x1xf32>
    %274 = arith.mulf %265, %265 : vector<32x32xf32>
    %cst_97 = arith.constant dense<0.000000e+00> : vector<32xf32>
    %275 = vector.multi_reduction <add>, %274, %cst_97 [1] : vector<32x32xf32> to vector<32xf32>
    %276 = vector.shape_cast %275 : vector<32xf32> to vector<32x1xf32>
    %cst_98 = arith.constant 3.200000e+01 : f32
    %277 = vector.broadcast %cst_98 : f32 to vector<32x1xf32>
    %278 = arith.divf %276, %277 : vector<32x1xf32>
    %279 = arith.mulf %273, %273 : vector<32x1xf32>
    %280 = arith.subf %278, %279 : vector<32x1xf32>
    %281 = vector.broadcast %273 : vector<32x1xf32> to vector<32x32xf32>
    %282 = arith.subf %265, %281 : vector<32x32xf32>
    %cst_99 = arith.constant 9.99999974E-6 : f32
    %283 = vector.broadcast %cst_99 : f32 to vector<32x1xf32>
    %284 = arith.addf %280, %283 : vector<32x1xf32>
    %285 = math.rsqrt %284 : vector<32x1xf32>
    %286 = vector.broadcast %285 : vector<32x1xf32> to vector<32x32xf32>
    %287 = arith.mulf %282, %286 : vector<32x32xf32>
    %288 = vector.broadcast %267 : vector<1x32xf32> to vector<32x32xf32>
    %289 = arith.mulf %287, %288 : vector<32x32xf32>
    %290 = vector.broadcast %269 : vector<1x32xf32> to vector<32x32xf32>
    %291 = arith.addf %289, %290 : vector<32x32xf32>
    %292 = vector.shape_cast %291 : vector<32x32xf32> to vector<2x16x32xf32>
    %c0_100 = arith.constant 0 : index
    %c0_101 = arith.constant 0 : index
    %c0_102 = arith.constant 0 : index
    %293 = vector.load %arg16[%c0_100, %c0_101, %c0_102] : memref<2x16x32xf32, #tpu.memory_space<vmem>>, vector<2x16x32xf32>
    tpu.vector_store %arg16[%c0_100, %c0_101, %c0_102], %292 {strides = array<i32>} : memref<2x16x32xf32, #tpu.memory_space<vmem>>, vector<2x16x32xf32>,
    return
  }
  func.func @transform_0(%arg0: i32, %arg1: i32) -> (i32, i32, i32) {
    %c0_i32 = arith.constant 0 : i32
    %c0_i32_0 = arith.constant 0 : i32
    %c0_i32_1 = arith.constant 0 : i32
    return %arg0, %c0_i32, %c0_i32_0 : i32, i32, i32
  }
  func.func @transform_1(%arg0: i32, %arg1: i32) -> (i32, i32) {
    %c0_i32 = arith.constant 0 : i32
    %c0_i32_0 = arith.constant 0 : i32
    return %arg0, %c0_i32 : i32, i32
  }
  func.func @transform_2(%arg0: i32, %arg1: i32) -> (i32, i32, i32) {
    %c0_i32 = arith.constant 0 : i32
    %c0_i32_0 = arith.constant 0 : i32
    %c0_i32_1 = arith.constant 0 : i32
    return %arg1, %c0_i32, %c0_i32_0 : i32, i32, i32
  }
  func.func @transform_3(%arg0: i32, %arg1: i32) -> (i32, i32, i32) {
    %c0_i32 = arith.constant 0 : i32
    %c0_i32_0 = arith.constant 0 : i32
    %c0_i32_1 = arith.constant 0 : i32
    return %arg1, %c0_i32, %c0_i32_0 : i32, i32, i32
  }
  func.func @transform_4(%arg0: i32, %arg1: i32) -> (i32, i32, i32) {
    %c0_i32 = arith.constant 0 : i32
    %c0_i32_0 = arith.constant 0 : i32
    %c0_i32_1 = arith.constant 0 : i32
    return %arg1, %c0_i32, %c0_i32_0 : i32, i32, i32
  }
  func.func @transform_5(%arg0: i32, %arg1: i32) -> (i32, i32, i32) {
    %c0_i32 = arith.constant 0 : i32
    %c0_i32_0 = arith.constant 0 : i32
    %c0_i32_1 = arith.constant 0 : i32
    return %arg1, %c0_i32, %c0_i32_0 : i32, i32, i32
  }
  func.func @transform_6(%arg0: i32, %arg1: i32) -> (i32, i32, i32) {
    %c0_i32 = arith.constant 0 : i32
    %c0_i32_0 = arith.constant 0 : i32
    %c0_i32_1 = arith.constant 0 : i32
    return %arg1, %c0_i32, %c0_i32_0 : i32, i32, i32
  }
  func.func @transform_7(%arg0: i32, %arg1: i32) -> (i32, i32, i32) {
    %c0_i32 = arith.constant 0 : i32
    %c0_i32_0 = arith.constant 0 : i32
    %c0_i32_1 = arith.constant 0 : i32
    return %arg1, %c0_i32, %c0_i32_0 : i32, i32, i32
  }
  func.func @transform_8(%arg0: i32, %arg1: i32) -> (i32, i32, i32) {
    %c0_i32 = arith.constant 0 : i32
    %c0_i32_0 = arith.constant 0 : i32
    %c0_i32_1 = arith.constant 0 : i32
    return %arg1, %c0_i32, %c0_i32_0 : i32, i32, i32
  }
  func.func @transform_9(%arg0: i32, %arg1: i32) -> (i32, i32, i32) {
    %c0_i32 = arith.constant 0 : i32
    %c0_i32_0 = arith.constant 0 : i32
    %c0_i32_1 = arith.constant 0 : i32
    return %arg1, %c0_i32, %c0_i32_0 : i32, i32, i32
  }
  func.func @transform_10(%arg0: i32, %arg1: i32) -> (i32, i32, i32) {
    %c0_i32 = arith.constant 0 : i32
    %c0_i32_0 = arith.constant 0 : i32
    %c0_i32_1 = arith.constant 0 : i32
    return %arg1, %c0_i32, %c0_i32_0 : i32, i32, i32
  }
  func.func @transform_11(%arg0: i32, %arg1: i32) -> (i32, i32, i32) {
    %c0_i32 = arith.constant 0 : i32
    %c0_i32_0 = arith.constant 0 : i32
    %c0_i32_1 = arith.constant 0 : i32
    return %arg1, %c0_i32, %c0_i32_0 : i32, i32, i32
  }
  func.func @transform_12(%arg0: i32, %arg1: i32) -> (i32, i32, i32) {
    %c0_i32 = arith.constant 0 : i32
    %c0_i32_0 = arith.constant 0 : i32
    %c0_i32_1 = arith.constant 0 : i32
    return %arg1, %c0_i32, %c0_i32_0 : i32, i32, i32
  }
  func.func @transform_13(%arg0: i32, %arg1: i32) -> (i32, i32, i32) {
    %c0_i32 = arith.constant 0 : i32
    %c0_i32_0 = arith.constant 0 : i32
    %c0_i32_1 = arith.constant 0 : i32
    return %arg1, %c0_i32, %c0_i32_0 : i32, i32, i32
  }
  func.func @transform_14(%arg0: i32, %arg1: i32) -> (i32, i32, i32) {
    %c0_i32 = arith.constant 0 : i32
    %c0_i32_0 = arith.constant 0 : i32
    %c0_i32_1 = arith.constant 0 : i32
    return %arg0, %c0_i32, %c0_i32_0 : i32, i32, i32
  }
  func.func @transform_15(%arg0: i32, %arg1: i32) -> (i32, i32, i32, i32) {
    %c0_i32 = arith.constant 0 : i32
    %c0_i32_0 = arith.constant 0 : i32
    %c0_i32_1 = arith.constant 0 : i32
    return %arg0, %arg1, %c0_i32, %c0_i32_0 : i32, i32, i32, i32
  }
}

</mosaic_0001>

<bundles_post_ra>
// kernel: tpu_custom_call.1
= control target key start
LH: loop header
LB: loop body
LE: loop exit
PB: predicated region body
PF: predicated region fallthrough
CT: control target
= control target key end

     0   :  { %s4216_s0 = inlined_call_operand.vmem [shape: f32[2,16,32], index: 0, kind: input, shape index: {}]   ;;  %s4217_s1 = inlined_call_operand.vmem [shape: f32[2,16], index: 1, kind: input, shape index: {}]   ;;  %s4218_s2 = inlined_call_operand.vmem [shape: bf16[2,32,96], index: 2, kind: input, shape index: {}]   ;;  %s4219_s3 = inlined_call_operand.vmem [shape: f32[2,1,96], index: 3, kind: input, shape index: {}]   ;;  %s4220_s4 = inlined_call_operand.vmem [shape: bf16[2,32,32], index: 4, kind: input, shape index: {}]   ;;  %s4221_s5 = inlined_call_operand.vmem [shape: f32[2,1,32], index: 5, kind: input, shape index: {}]   ;;  %s4222_s6 = inlined_call_operand.vmem [shape: f32[2,1,32], index: 6, kind: input, shape index: {}]   ;;  %s4223_s7 = inlined_call_operand.vmem [shape: f32[2,1,32], index: 7, kind: input, shape index: {}]   ;;  %s4224_s8 = inlined_call_operand.vmem [shape: f32[2,1,32], index: 8, kind: input, shape index: {}]   ;;  %s4225_s9 = inlined_call_operand.hbm [shape: f32[2,1,32], index: 9, kind: input, shape index: {}]   ;;  %s4226_s10 = inlined_call_operand.hbm [shape: bf16[2,32,64], index: 10, kind: input, shape index: {}]   ;;  %s4227_s11 = inlined_call_operand.hbm [shape: f32[2,1,64], index: 11, kind: input, shape index: {}]   ;;  %s4228_s12 = inlined_call_operand.vmem [shape: bf16[2,64,32], index: 12, kind: input, shape index: {}]   ;;  %s4229_s13 = inlined_call_operand.vmem [shape: f32[2,1,32], index: 13, kind: input, shape index: {}]   ;;  %s4230_s14 = inlined_call_operand.hbm [shape: f32[2,16,32], index: 14, kind: output, shape index: {0}]   ;;  %s4231_s15 = inlined_call_operand.hbm [shape: f32[2,2,16,16], index: 15, kind: output, shape index: {1}]  }
   0x1   :  { %4251 = sst [smem:[#allocation26_spill]] %s4216_s0 }
   0x2   :  { %4252 = sst [smem:[#allocation27_spill]] %s4217_s1 }
   0x3   :  { %4253 = sst [smem:[#allocation28_spill]] %s4218_s2 }
   0x4   :  { %4254 = sst [smem:[#allocation29_spill]] %s4220_s4 }
   0x5   :  { %4255 = sst [smem:[#allocation30_spill]] %s4225_s9 }
   0x6   :  { %4256 = sst [smem:[#allocation31_spill]] %s4226_s10 }
   0x7   :  { %4257 = sst [smem:[#allocation32_spill]] %s4227_s11 }
   0x8   :  { %4258 = sst [smem:[#allocation33_spill]] %s4228_s12 }
   0x9   :  { %4259 = sst [smem:[#allocation34_spill]] %s4229_s13 }
   0xa   :  { %4260 = sst [smem:[#allocation35_spill]] %s4230_s14 }
   0xb   :  { %4261 = sst [smem:[#allocation36_spill]] %s4231_s15 }
   0xc   :  { %21 = vsyncpa [#allocation3], 0 }
   0xd   :  { %23 = vsyncpa [#allocation3 + $0x1], 0 }
   0xe   :  { %24 = vsyncpa [#allocation6], 0 }
   0xf   :  { %26 = vsyncpa [#allocation6 + $0x1], 0 }
  0x10   :  { %27 = vsyncpa [#allocation4], 0 }
  0x11   :  { %28 = vsyncpa [#allocation10], 0 }
  0x12   :  { %30 = vsyncpa [#allocation10 + $0x1], 0  ;;  %s3492_s18 = smov 0   ;;  %s3494_s19 = smov 0  }
  0x13   :  { %s3496_s20 = smov 0   ;;  %s3498_s21 = smov 0  }
  0x14   :  { %s3500_s22 = smov 0   ;;  %s3502_s23 = smov 0  }
  0x15 LB: > { %4262 = sst [smem:[#allocation17_spill]] %s3360_s18  ;;  %s3523_s24 = sadd.s32 4294967295, %s3380_s23   ;;  %s3380_s23 = sphi %s3502_s23, %s36_s23   ;;  %s3376_s22 = sphi %s3500_s22, %s4319_s22   ;;  %s3372_s21 = sphi %s3498_s21, %s4318_s21   ;;  %s3368_s20 = sphi %s3496_s20, %s4317_s20   ;;  %s3364_s19 = sphi %s3494_s19, %s4316_s19   ;;  %s3360_s18 = sphi %s3492_s18, %s4315_s18  }
  0x16   : > { %4263 = sst [smem:[#allocation18_spill]] %s3364_s19  ;;  %s2707_s25 = sadd.s32 4294967294, %s3380_s23  }
  0x17   : > { %4264 = sst [smem:[#allocation19_spill]] %s3368_s20  ;;  %s45_s26 = sadd.s32 1, %s3376_s22 }
  0x18   : > { %4265 = sst [smem:[#allocation20_spill]] %s3376_s22  ;;  %s289_s27 = sadd.s32 1, %s3368_s20 }
  0x19   : > { %4266 = sst [smem:[#allocation21_spill]] %s3380_s23  ;;  %p46_p0 = scmp.ge.s32.totalorder %s45_s26, 2 }
  0x1a   : > { %p296_p1 = scmp.ne.s32.totalorder %s3368_s20, %s3364_s19  ;;  %p297_p2 = scmp.eq.s32.totalorder %s3380_s23, 0 }
  0x1b   : > { %p302_p3 = scmp.ne.s32.totalorder %s3364_s19, %s3360_s18  ;;  %s4321_s26 = smov (%p46_p0, %s45_s26), 0 }
  0x1c   : > { %4267 = sst [smem:[#allocation22_spill]] %s4321_s26  ;;  %p3535_p4 = por %p297_p2, %p296_p1 }
  0x1d   : > { %p303_p5 = scmp.eq.s32.totalorder %s3523_s24, 0  ;;  %s286_s29 = ssub.s32 %s3376_s22, %s4321_s26 }
  0x1e   : > { %p4241_p6 = scmp.eq.s32.totalorder %s3523_s24, 1  ;;  %p287_p7 = scmp.eq.s32.totalorder %s286_s29, 0 }
  0x1f   : > { %p3543_p8 = por %p303_p5, %p302_p3  ;;  %p464_p10 = scmp.eq.s32.totalorder %s2707_s25, 1 }
  0x20   : > { %p3549_p9 = por %p4241_p6, %p296_p1  ;;  %p2999_p13 = scmp.lt.s32.totalorder %s3380_s23, 2 }
  0x21   : > { %s4269_s30 = scalar_select %p3543_p8, 1, 0 }
  0x22   : > { %s4270_s16 = scalar_select %p3549_p9, 1, 0 }
  0x23   : > { %s3554_s17 = scalar_select %p287_p7, %s3368_s20, %s289_s27  }
  0x24   : > { %4271 = sst [smem:[#allocation23_spill]] %s4270_s16  ;;  %p3556_p11 = por %p464_p10, %p302_p3 }
  0x25   : > { %4272 = sst [smem:[#allocation24_spill]] %s3554_s17  ;;  %s3563_s26 = sand.u32 1, %s3368_s20  }
  0x26   : > { %s4273_s18 = scalar_select %p3556_p11, 1, 0 }
  0x27   : > { %s564_s29 = sand.u32 1, %s3380_s23   ;;  %s2713_s15 = sshll.u32 %s3563_s26, 4 }
  0x28   : > { %4274 = sst [smem:[#allocation25_spill]] %s4273_s18  ;;  %p3569_p0 = pnand %p2999_p13, %p3535_p4 }
  0x29   : > { %s2780_s25 = sshll.u32 %s3376_s22, 8  ;;  %s4276_s10 = sld [smem:[#allocation31_spill]] }
  0x2a   : > { %s4275_s14 = scalar_select %p3569_p0, 1, 0 }
  0x2b   : > { %s568_s20 = scalar_lea.vmem [#allocation5], %s2713_s15  ;;  %s3581_s28 = scalar_lea.sflag [#allocation6], %s564_s29 }
  0x2c   : > { %s575_s18 = sshll.u32 %s568_s20, 4  ;;  %p3587_p2 = pneg %p3569_p0  ;;  %s3579_s18 = int_to_ptr.vmem [resolvable:$true] %s575_s18 }
  0x2f   : > { %s3577_s16 = scalar_lea.hbm %s4276_s10, %s2780_s25  ;;  %s3207_s15 = scalar_lea.hbm %s4276_s10, 512 }
  0x30   : > { %s3202_s1 = scalar_lea.hbm %s3577_s16, 256  ;;  %p3208_p5 = scmp.lt.u32.totalorder %s3577_s16, %s4276_s10 }
  0x31   : > { %p3203_p1 = scmp.ne.s32.totalorder %s3577_s16, %s3202_s1  ;;  %p3209_p7 = scmp.lt.u32.totalorder %s3207_s15, %s3202_s1 }
  0x32   : > { %p3211_p13 = scmp.lt.u32.totalorder %s3202_s1, %s3577_s16 }
  0x33   : > { %p3205_p3 = pnand %p3587_p2, %p3203_p1  ;;  %p3210_p10 = por %p3209_p7, %p3208_p5 }
  0x35   : > { %p3206_p4 = pneg %p3205_p3  ;;  %p3212_p12 = por %p3211_p13, %p3210_p10 }
  0x37   : > { %p3213_p6 = pnand %p3212_p12, %p3206_p4 }
  0x39   : > { %3216 = shalt.err (!%p3213_p6)
}
  0x3a   : > { %s3217_s29 = scalar_lea.vmem %s3579_s18, 256  ;;  %s3382_s17 = smov [#allocation5]  }
  0x3b   : > { %p3218_p1 = scmp.ne.s32.totalorder %s3579_s18, %s3217_s29  ;;  %s3222_s25 = sshll.u32 %s3382_s17, 4  ;;  %s3223_s25 = int_to_ptr.vmem [resolvable:$false] %s3222_s25 }
  0x3c   : > { %s3224_s20 = scalar_lea.vmem %s3223_s25, 512  ;;  %p3225_p9 = scmp.lt.s32.totalorder %s3579_s18, %s3223_s25 }
  0x3d   : > { %p3220_p3 = pnand %p3218_p1, %p3587_p2  ;;  %p3226_p8 = scmp.lt.s32.totalorder %s3224_s20, %s3217_s29 }
  0x3f   : > { %p3221_p11 = pneg %p3220_p3  ;;  %p3227_p5 = por %p3226_p8, %p3225_p9 }
  0x41   : > { %p3228_p7 = pnand %p3227_p5, %p3221_p11 }
  0x43   : > { %3231 = shalt.err (!%p3228_p7)
}
  0x44   : > { %s3383_s1 = smov 64   ;;  %s3384_s15 = smov 4  }
  0x45   : > { %2991 = dma.hbm_to_vmem [thread:$0]  (!%p3569_p0), %s3577_s16, 256, %s3579_s18, %s3581_s28, %s3383_s1, %s3383_s1, %s3384_s15  }
  0x46   : > { %p2717_p6 = scmp.ge.s32.totalorder %s3380_s23, 1  ;;  %p614_p12 = scmp.lt.s32.totalorder %s3380_s23, 3 }
  0x47   : > { %s4246_s29 = sshll.u32 %s3376_s22, 4  ;;  %s4279_s9 = sld [smem:[#allocation30_spill]] }
  0x48   : > { %p3613_p8 = pnand %p2717_p6, %p614_p12  ;;  %s550_s10 = scalar_lea.vmem [#allocation2], %s3563_s26 }
  0x49   : > { %s557_s12 = sshll.u32 %s550_s10, 4  ;;  %s548_s18 = scalar_lea.sflag [#allocation3], %s3563_s26  ;;  %s558_s12 = int_to_ptr.vmem [resolvable:$true] %s557_s12 }
  0x4a   : > { %s4278_s27 = scalar_select %p3613_p8, 1, 0 }
  0x4d   : > { %s3623_s20 = scalar_lea.hbm %s4279_s9, %s4246_s29  ;;  %s3237_s23 = scalar_lea.hbm %s4279_s9, 32 }
  0x4e   : > { %s3232_s16 = scalar_lea.hbm %s3623_s20, 16  ;;  %p3238_p10 = scmp.lt.u32.totalorder %s3623_s20, %s4279_s9 }
  0x4f   : > { %p3233_p9 = scmp.ne.s32.totalorder %s3623_s20, %s3232_s16  ;;  %p3239_p13 = scmp.lt.u32.totalorder %s3237_s23, %s3232_s16 }
  0x50   : > { %p3241_p3 = scmp.lt.u32.totalorder %s3232_s16, %s3623_s20 }
  0x51   : > { %p3235_p11 = pnand %p3233_p9, %p3587_p2  ;;  %p3240_p1 = por %p3239_p13, %p3238_p10 }
  0x53   : > { %p3236_p4 = pneg %p3235_p11  ;;  %p3242_p5 = por %p3241_p3, %p3240_p1 }
  0x55   : > { %p3243_p7 = pnand %p3242_p5, %p3236_p4 }
  0x57   : > { %3246 = shalt.err (!%p3243_p7)
}
  0x58   : > { %s3247_s10 = scalar_lea.vmem %s558_s12, 16  ;;  %s3385_s29 = smov [#allocation2]  }
  0x59   : > { %p3248_p6 = scmp.ne.s32.totalorder %s558_s12, %s3247_s10  ;;  %s3252_s13 = sshll.u32 %s3385_s29, 4  ;;  %s3253_s13 = int_to_ptr.vmem [resolvable:$false] %s3252_s13 }
  0x5a   : > { %s3254_s1 = scalar_lea.vmem %s3253_s13, 32  ;;  %p3255_p11 = scmp.lt.s32.totalorder %s558_s12, %s3253_s13 }
  0x5b   : > { %p3250_p12 = pnand %p3248_p6, %p3587_p2  ;;  %p3256_p8 = scmp.lt.s32.totalorder %s3254_s1, %s3247_s10 }
  0x5d   : > { %p3251_p9 = pneg %p3250_p12  ;;  %p3257_p0 = por %p3256_p8, %p3255_p11 }
  0x5f   : > { %p3258_p10 = pnand %p3257_p0, %p3251_p9 }
  0x61   : > { %3261 = shalt.err (!%p3258_p10)
}
  0x62   : > { %p4280_p13 = scmp.ne.s32.totalorder %s4275_s14, 0  ;;  %s4281_s23 = sshll.u32 %s3376_s22, 4 }
  0x63   : > { %s4282_s11 = sld [smem:[#allocation32_spill]]  ;;  %s588_s13 = scalar_lea.vmem [#allocation7], %s3563_s26 }
  0x64   : > { %2988 = dma.hbm_to_vmem [thread:$0]  (!%p4280_p13), %s3623_s20, 16, %s558_s12, %s548_s18  }
  0x65   : > { %s595_s29 = sshll.u32 %s588_s13, 4  ;;  %s596_s29 = int_to_ptr.vmem [resolvable:$true] %s595_s29 }
  0x69   : > { %s3649_s17 = scalar_lea.hbm %s4282_s11, %s4281_s23  ;;  %s3267_s20 = scalar_lea.hbm %s4282_s11, 32 }
  0x6a   : > { %s3262_s25 = scalar_lea.hbm %s3649_s17, 16  ;;  %p3268_p1 = scmp.lt.u32.totalorder %s3649_s17, %s4282_s11 }
  0x6b   : > { %p3263_p0 = scmp.ne.s32.totalorder %s3649_s17, %s3262_s25  ;;  %p3269_p3 = scmp.lt.u32.totalorder %s3267_s20, %s3262_s25 }
  0x6c   : > { %p3271_p7 = scmp.lt.u32.totalorder %s3262_s25, %s3649_s17 }
  0x6d   : > { %p3265_p8 = pnand %p3263_p0, %p3587_p2  ;;  %p3270_p5 = por %p3269_p3, %p3268_p1 }
  0x6f   : > { %p3266_p4 = pneg %p3265_p8  ;;  %p3272_p6 = por %p3271_p7, %p3270_p5 }
  0x71   : > { %p3273_p12 = pnand %p3272_p6, %p3266_p4 }
  0x73   : > { %3276 = shalt.err (!%p3273_p12)
}
  0x74   : > { %s3277_s26 = scalar_lea.vmem %s596_s29, 16  ;;  %s3386_s23 = smov [#allocation7]  }
  0x75   : > { %p3278_p9 = scmp.ne.s32.totalorder %s596_s29, %s3277_s26  ;;  %s3282_s16 = sshll.u32 %s3386_s23, 4  ;;  %s3283_s16 = int_to_ptr.vmem [resolvable:$false] %s3282_s16 }
  0x76   : > { %s3284_s15 = scalar_lea.vmem %s3283_s16, 32  ;;  %p3285_p0 = scmp.lt.s32.totalorder %s596_s29, %s3283_s16 }
  0x77   : > { %p3280_p11 = pnand %p3278_p9, %p3587_p2  ;;  %p3286_p8 = scmp.lt.s32.totalorder %s3284_s15, %s3277_s26 }
  0x79   : > { %p3281_p10 = pneg %p3280_p11  ;;  %p3287_p13 = por %p3286_p8, %p3285_p0 }
  0x7b   : > { %p3288_p1 = pnand %p3287_p13, %p3281_p10 }
  0x7d   : > { %3291 = shalt.err (!%p3288_p1)
}
  0x7e   : > { %p4283_p3 = scmp.ne.s32.totalorder %s4275_s14, 0  ;;  %p4284_p4 = scmp.ne.s32.totalorder %s4278_s27, 0 }
  0x7f   : > { %s3673_s0 = sand.u32 (!%p4284_p4), 1, %s3364_s19   ;;  %p4285_p2 = scmp.ne.s32.totalorder (!%p4284_p4), %s4269_s30, 0 }
  0x80   : > { %2994 = dma.hbm_to_vmem [thread:$0]  (!%p4283_p3), %s3649_s17, 16, %s596_s29, %s3581_s28  }
  0x81   : > { %618 = sbr.rel (%p4284_p4) target bundleno = 2524 (0x9dc), region = 76  ;;  %s621_s13 = scalar_lea.sflag (!%p4284_p4), [#allocation3], %s3673_s0 }
  0x88   : > { %3343 = dma.done.wait (%p4285_p2), %s621_s13, 16  }
  0x89   : > { %3345 = vsyncadd (%p4285_p2), %s621_s13, 4294967280  ;;  %s628_s14 = sand.u32 1, %s3523_s24   ;;  %s2718_s28 = sshll.u32 %s3673_s0, 4 }
  0x8a   : > { %s629_s27 = scalar_lea.sflag [#allocation6], %s628_s14  ;;  %s3683_s17 = scalar_lea.vmem [#allocation5], %s2718_s28 }
  0x8b   : > { %3347 = dma.done.wait (%p4285_p2), %s629_s27, 272  }
  0x8c   : > { %3349 = vsyncadd (%p4285_p2), %s629_s27, 4294967024  ;;  %s2719_s29 = sshll.u32 %s3673_s0, 5  ;;  %p749_p13 = scmp.lt.s32.totalorder %s3372_s21, 1 }
  0x8d   : > { %s4286_s2 = sld [smem:[#allocation28_spill]]  ;;  %s4287_s4 = sld [smem:[#allocation29_spill]] }
  0x8e   : > { %s3692_s10 = scalar_select %p749_p13, %s3372_s21, 1 }
  0x8f   : > { %s4288_s15 = sld [smem:[#allocation34_spill]]  ;;  %s4289_s28 = sld [smem:[#allocation33_spill]] }
  0x90   : > { %s2781_s12 = sshll.u32 %s3692_s10, 4  ;;  %s767_s11 = scalar_lea.vmem %s4222_s6, %s3692_s10 }
  0x91   : > { %s640_s9 = scalar_lea.vmem [#allocation7], %s3673_s0  ;;  %s3734_s25 = scalar_lea.vmem [#allocation9], %s2719_s29 }
  0x92   : > { %p2726_p5 = scmp.ne.s32.totalorder %s3372_s21, 0 }
  0x93   : > { %s753_s23 = scalar_lea.vmem %s4286_s2, %s2781_s12  ;;  %s3705_s13 = scalar_lea.vmem %s4287_s4, %s2781_s12  ;;  %vm793_vm0 = vcmask (!%p2726_p5), 261120  }
  0x94   : > { %s2783_s2 = sshll.u32 %s3692_s10, 5  ;;  %788 = sbr.rel (%p2726_p5) target bundleno = 160 (0xa0), region = 92 }
  0x95   : > { %s781_s4 = scalar_lea.vmem %s4288_s15, %s3692_s10  ;;  %s3731_s27 = scalar_lea.vmem %s4289_s28, %s2783_s2 }
  0x96   : > { %s4290_s18 = sld [smem:[#allocation26_spill]] (!%p2726_p5) }
  0x9c   : > { %s4291_s1 = smov %s4290_s18  ;;  %v789_v0 = vld [vmem:[%s4290_s18] sm:$0xff] }
  0x9d   : > { %v790_v1 = vld [vmem:[%s4291_s1 + $0x8] sm:$0xff]  ;;  %v791_v2 = vld [vmem:[%s4291_s1 + $0x10] sm:$0xff]  ;;  %794 = vst.msk [vmem:[#allocation8] sm:$0xff] %vm793_vm0, %v789_v0  ;;  %v792_v3 = vld [vmem:[%s4291_s1 + $0x18] sm:$0xff] }
  0x9e   : > { %795 = vst.msk [vmem:[#allocation8 + $0x8] sm:$0xff] %vm793_vm0, %v790_v1  ;;  %796 = vst.msk [vmem:[#allocation8 + $0x10] sm:$0xff] %vm793_vm0, %v791_v2 }
  0x9f   : > { %797 = vst.msk [vmem:[#allocation8 + $0x18] sm:$0xff] %vm793_vm0, %v792_v3 }
  0xa0 PF: > { %v3108_v4 = vld [vmem:[%s753_s23] sm:$0xff]   ;;  %v3109_v5 = vld [vmem:[%s753_s23 + $0x8] sm:$0xff]   ;;  %vm827_vm1 = vcmask 261120   ;;  %v3387_v12 = vmov 0.0   ;;  %s4292_s30 = scalar_lea.vmem %s4219_s3, %s3692_s10  ;;  %vm3388_vm2 = vmmov 0   ;;  %s3389_s26 = smov 120  }
  0xa1   : > { %2835 = vmatprep.subr.bf16.mxu0 %v3108_v4  ;;  %2843 = vmatprep.subr.bf16.mxu1 %v3387_v12  ;;  %v2727_v14 = vld [vmem:[%s4292_s30] ss:$0 sm:$0xff]  ;;  %s3390_s15 = smov 96   ;;  %s3391_s14 = smov 80   ;;  %vm892_vm3 = vcmask 64512   ;;  %vm940_vm4 = vcmask 130048  }
  0xa2   : > { %2836 = vmatpush3.bf16.msra.mxu0 %v3108_v4  ;;  %2845 = vmatprep.mubr.msk.bf16.mxu1 %vm3388_vm2, %v3387_v12  ;;  %s3392_s28 = smov 88   ;;  %s3393_s22 = smov 72   ;;  %vm1414_vm5 = vcmask 195584   ;;  %vm2241_vm6 = vcmask 523264  }
  0xa3   : > { %2837 = vmatprep.subr.bf16.mxu0 %v3109_v5  ;;  %s3394_s20 = smov 112   ;;  %s3395_s18 = smov 104  }
  0xa4   : > { %v798_v6 = vld [vmem:[#allocation8] sm:$0xff]  ;;  %s3396_s16 = smov 64   ;;  %s4293_s19 = sld [smem:[#allocation27_spill]] }
  0xa5   : > { %v799_v7 = vld [vmem:[#allocation8 + $0x8] sm:$0xff]  ;;  %v800_v8 = vld [vmem:[#allocation8 + $0x10] sm:$0xff]  ;;  %s4296_s23 = scalar_lea.vmem %s4223_s7, %s3692_s10  ;;  %p4300_p6 = scmp.eq.s32.totalorder %s3523_s24, 1 }
  0xa6   : > { %v802_v9 = vpack.c.bf16 %v799_v7, %v798_v6  ;;  %v801_v10 = vld [vmem:[#allocation8 + $0x18] sm:$0xff]  ;;  %2838 = vmatpush3.bf16.msra.mxu0 %v3109_v5 }
  0xa7   : > { %v803_v11 = vpack.c.bf16 %v801_v10, %v800_v8  ;;  %2849 = vmatprep.subr.bf16.mxu0 %v3387_v12 }
  0xa8   : > { %2839 = vmatprep.mubr.msk.bf16.mxu0 %vm827_vm1, %v802_v9 }
  0xa9   : > { %2840 = vmatmul.mubr.msk.bf16.vlgmr.msra.gmra.mrb[0].mxu0 %vm827_vm1, %v803_v11 }
  0xaa   : > { %2851 = vmatprep.mubr.msk.bf16.mxu0 %vm3388_vm2, %v3387_v12  ;;  %s4294_s29 = smov %s4293_s19  ;;  %v2732_v47 = vld [vmem:[%s4293_s19] ss:$0 sm:$0xff] }
 0x17c   : > { %v2841_v13 = vpop.f32.mrb[0].mxu0 }
 0x17d   : > { %v868_v15 = vpop.f32.mrb[1].mxu0  ;;  %v877_v17 = vadd.f32 %v2841_v13, %v2727_v14 }
 0x17e   : > { %v2842_v16 = vpop.f32.mrb[2].mxu0  ;;  %v869_v20 = vadd.f32 %v2727_v14, %v868_v15 }
 0x17f   : > { %v880_v18 = vadd.f32 %v2842_v16, %v2727_v14  ;;  %v871_v19 = vpop.f32.mrb[3].mxu0 }
 0x180   : > { %v872_v21 = vadd.f32 %v2727_v14, %v871_v19 }
 0x181   : > { %v3762_v22 = vpack.c.bf16 %v880_v18, %v877_v17  ;;  %v2741_v17 = vld [vmem:[%s4294_s29 + $0x1] ss:$0 sm:$0xff] }
 0x182   : > { %v3764_v23 = vpack.c.bf16 %v872_v21, %v869_v20 }
 0x184   : > { %1013 = vrot.lane.b32.xlu1 %v3764_v23, %s3389_s26  ;;  %890 = vrot.lane.b32.xlu0 %v3764_v23, %s3390_s15 }
 0x188   : > { %1138 = vrot.lane.b32.xlu1 %v3764_v23, %s3391_s14  ;;  %1015 = vrot.lane.b32.xlu0 %v3764_v23, %s3392_s28 }
 0x18c   : > { %1261 = vrot.lane.b32.xlu1 %v3764_v23, %s3393_s22  ;;  %1136 = vrot.lane.b32.xlu0 %v3764_v23, %s3394_s20 }
 0x190   : > { %1424 = vrot.lane.b32.xlu1 %v3762_v22, %s3390_s15  ;;  %1259 = vrot.lane.b32.xlu0 %v3764_v23, %s3395_s18  ;;  %s3398_s15 = smov 56  }
 0x194   : > { %1545 = vrot.lane.b32.xlu1 %v3762_v22, %s3389_s26  ;;  %1547 = vrot.lane.b32.xlu0 %v3762_v22, %s3392_s28  ;;  %s3397_s26 = smov 48   ;;  %s3400_s28 = smov 8  }
 0x198   : > { %1668 = vrot.lane.b32.xlu1 %v3762_v22, %s3394_s20  ;;  %1670 = vrot.lane.b32.xlu0 %v3762_v22, %s3391_s14  ;;  %s3399_s14 = smov 40   ;;  %s3402_s20 = smov 24  }
 0x19c   : > { %1791 = vrot.lane.b32.xlu1 %v3762_v22, %s3395_s18  ;;  %1793 = vrot.lane.b32.xlu0 %v3762_v22, %s3393_s22  ;;  %s3401_s22 = smov 16  }
 0x1a0   : > { %966 = vrot.lane.b32.xlu1 %v3764_v23, %s3396_s16 }
 0x1f6   : > { %v1014_v24 = vpop.permute.xlu1 %1013  ;;  %v891_v25 = vpop.permute.xlu0 %890 }
 0x1f7   : > { %v897_v26 = vsel %vm892_vm3, %v891_v25, 0 }
 0x1f8   : > { %2844 = vmatpush3.bf16.xpose.msra.mxu1 %v897_v26 }
 0x1f9   : > { %2855 = vmatprep.subr.bf16.mxu1 %v3387_v12 }
 0x1fa   : > { %v1139_v27 = vpop.permute.xlu1 %1138  ;;  %v1016_v28 = vpop.permute.xlu0 %1015 }
 0x1fb   : > { %v1021_v30 = vsel %vm892_vm3, %v1016_v28, 0  ;;  %v1144_v33 = vsel %vm892_vm3, %v1139_v27, 0 }
 0x1fe   : > { %v1262_v29 = vpop.permute.xlu1 %1261  ;;  %v1137_v35 = vpop.permute.xlu0 %1136 }
 0x1ff   : > { %2846 = vmatmul.mubr.msk.bf16.vlgmr.msra.gmra.mrb[0].mxu1 %vm892_vm3, %v3764_v23  ;;  %v1267_v37 = vsel %vm892_vm3, %v1262_v29, 0 }
 0x200   : > { %2856 = vmatpush3.bf16.xpose.msra.mxu1 %v1021_v30  ;;  %2857 = vmatprep.mubr.msk.bf16.mxu1 %vm3388_vm2, %v3387_v12 }
 0x201   : > { %2867 = vmatprep.subr.bf16.mxu1 %v3387_v12 }
 0x202   : > { %v1425_v31 = vpop.permute.xlu1 %1424  ;;  %v1260_v39 = vpop.permute.xlu0 %1259 }
 0x203   : > { %v1430_v40 = vsel %vm892_vm3, %v1425_v31, 0 }
 0x206   : > { %v1546_v32 = vpop.permute.xlu1 %1545  ;;  %v1548_v41 = vpop.permute.xlu0 %1547 }
 0x207   : > { %2858 = vmatmul.mubr.msk.bf16.vlgmr.msra.gmra.mrb[4].mxu1 %vm892_vm3, %v1014_v24  ;;  %v1553_v42 = vsel %vm892_vm3, %v1548_v41, 0 }
 0x208   : > { %2868 = vmatpush3.bf16.xpose.msra.mxu1 %v1144_v33  ;;  %2869 = vmatprep.mubr.msk.bf16.mxu1 %vm3388_vm2, %v3387_v12 }
 0x209   : > { %2879 = vmatprep.subr.bf16.mxu1 %v3387_v12 }
 0x20a   : > { %v1669_v34 = vpop.permute.xlu1 %1668  ;;  %v1671_v43 = vpop.permute.xlu0 %1670 }
 0x20b   : > { %v1676_v44 = vsel %vm892_vm3, %v1671_v43, 0 }
 0x20e   : > { %v1792_v36 = vpop.permute.xlu1 %1791  ;;  %v1794_v45 = vpop.permute.xlu0 %1793 }
 0x20f   : > { %2870 = vmatmul.mubr.msk.bf16.vlgmr.msra.gmra.mrb[8].mxu1 %vm892_vm3, %v1137_v35  ;;  %v1799_v46 = vsel %vm892_vm3, %v1794_v45, 0 }
 0x210   : > { %2880 = vmatpush3.bf16.xpose.msra.mxu1 %v1267_v37  ;;  %2881 = vmatprep.mubr.msk.bf16.mxu1 %vm3388_vm2, %v3387_v12 }
 0x211   : > { %2891 = vmatprep.subr.bf16.mxu1 %v3387_v12 }
 0x212   : > { %v967_v38 = vpop.permute.xlu1 %966 }
 0x213   : > { %2850 = vmatpush3.bf16.msra.mxu0 %v967_v38 }
 0x214   : > { %2861 = vmatprep.subr.bf16.mxu0 %v3387_v12 }
 0x217   : > { %2882 = vmatmul.mubr.msk.bf16.vlgmr.msra.gmra.mrb[12].mxu1 %vm892_vm3, %v1260_v39 }
 0x218   : > { %2892 = vmatpush3.bf16.xpose.msra.mxu1 %v1430_v40  ;;  %2893 = vmatprep.mubr.msk.bf16.mxu1 %vm3388_vm2, %v3387_v12 }
 0x219   : > { %2903 = vmatprep.subr.bf16.mxu1 %v3387_v12 }
 0x21f   : > { %2894 = vmatmul.mubr.msk.bf16.vlgmr.msra.gmra.mrb[16].mxu1 %vm892_vm3, %v3762_v22 }
 0x220   : > { %2904 = vmatpush3.bf16.xpose.msra.mxu1 %v1553_v42  ;;  %2905 = vmatprep.mubr.msk.bf16.mxu1 %vm3388_vm2, %v3387_v12 }
 0x221   : > { %2915 = vmatprep.subr.bf16.mxu1 %v3387_v12 }
 0x227   : > { %2906 = vmatmul.mubr.msk.bf16.vlgmr.msra.gmra.mrb[20].mxu1 %vm892_vm3, %v1546_v32 }
 0x228   : > { %2916 = vmatpush3.bf16.xpose.msra.mxu1 %v1676_v44  ;;  %2917 = vmatprep.mubr.msk.bf16.mxu1 %vm3388_vm2, %v3387_v12 }
 0x229   : > { %2927 = vmatprep.subr.bf16.mxu1 %v3387_v12 }
 0x22f   : > { %2918 = vmatmul.mubr.msk.bf16.vlgmr.msra.gmra.mrb[24].mxu1 %vm892_vm3, %v1669_v34 }
 0x230   : > { %2928 = vmatpush3.bf16.xpose.msra.mxu1 %v1799_v46  ;;  %2929 = vmatprep.mubr.msk.bf16.mxu1 %vm3388_vm2, %v3387_v12 }
 0x237   : > { %2930 = vmatmul.mubr.msk.bf16.vlgmr.msra.gmra.mrb[28].mxu1 %vm892_vm3, %v1792_v36 }
 0x2d2   : > { %v933_v48 = vpop.f32.mrb[0].mxu1 }
 0x2d3   : > { %v3825_v49 = vadd.f32 %v2732_v47, %v933_v48  ;;  %v2847_v50 = vpop.f32.mrb[1].mxu1 }
 0x2d4   : > { %v936_v51 = vpop.f32.mrb[2].mxu1 }
 0x2d5   : > { %v3827_v52 = vadd.f32 %v2732_v47, %v936_v51  ;;  %v2848_v53 = vpop.f32.mrb[3].mxu1  ;;  %v941_v54 = vsel %vm940_vm4, %v3825_v49, -inf }
 0x2d6   : > { %942 = vmax.xlane.f32.xlu0 %v941_v54 }
 0x2d7   : > { %v944_v55 = vsel %vm940_vm4, %v3827_v52, -inf }
 0x2d8   : > { %945 = vmax.xlane.f32.xlu1 %v944_v55 }
 0x2da   : > { %v1057_v56 = vpop.f32.mrb[4].mxu1 }
 0x2db   : > { %v3833_v57 = vadd.f32 %v2732_v47, %v1057_v56  ;;  %v2859_v58 = vpop.f32.mrb[5].mxu1 }
 0x2dc   : > { %v1060_v59 = vpop.f32.mrb[6].mxu1 }
 0x2dd   : > { %v3835_v60 = vadd.f32 %v2732_v47, %v1060_v59  ;;  %v2860_v61 = vpop.f32.mrb[7].mxu1  ;;  %v1064_v62 = vsel %vm940_vm4, %v3833_v57, -inf }
 0x2de   : > { %1065 = vmax.xlane.f32.xlu0 %v1064_v62 }
 0x2df   : > { %v1067_v63 = vsel %vm940_vm4, %v3835_v60, -inf }
 0x2e2   : > { %1068 = vmax.xlane.f32.xlu0 %v1067_v63  ;;  %v1180_v0 = vpop.f32.mrb[8].mxu1 }
 0x2e3   : > { %v3841_v1 = vadd.f32 %v2732_v47, %v1180_v0  ;;  %v2871_v2 = vpop.f32.mrb[9].mxu1 }
 0x2e4   : > { %v1183_v3 = vpop.f32.mrb[10].mxu1 }
 0x2e5   : > { %v3843_v4 = vadd.f32 %v2732_v47, %v1183_v3  ;;  %v2872_v5 = vpop.f32.mrb[11].mxu1  ;;  %v1187_v6 = vsel %vm940_vm4, %v3841_v1, -inf }
 0x2e6   : > { %1188 = vmax.xlane.f32.xlu1 %v1187_v6 }
 0x2e7   : > { %v1190_v7 = vsel %vm940_vm4, %v3843_v4, -inf }
 0x2e8   : > { %1191 = vmax.xlane.f32.xlu0 %v1190_v7 }
 0x2ea   : > { %v1303_v8 = vpop.f32.mrb[12].mxu1 }
 0x2eb   : > { %v3849_v9 = vadd.f32 %v2732_v47, %v1303_v8  ;;  %v2883_v10 = vpop.f32.mrb[13].mxu1 }
 0x2ec   : > { %v1306_v11 = vpop.f32.mrb[14].mxu1 }
 0x2ed   : > { %v3851_v13 = vadd.f32 %v2732_v47, %v1306_v11  ;;  %v2884_v14 = vpop.f32.mrb[15].mxu1  ;;  %v1310_v15 = vsel %vm940_vm4, %v3849_v9, -inf }
 0x2ee   : > { %1311 = vmax.xlane.f32.xlu1 %v1310_v15 }
 0x2ef   : > { %v1313_v16 = vsel %vm940_vm4, %v3851_v13, -inf }
 0x2f0   : > { %1314 = vmax.xlane.f32.xlu0 %v1313_v16 }
 0x2f2   : > { %v1466_v18 = vpop.f32.mrb[16].mxu1 }
 0x2f3   : > { %v3860_v19 = vadd.f32 %v2741_v17, %v1466_v18  ;;  %v2895_v20 = vpop.f32.mrb[17].mxu1 }
 0x2f4   : > { %v1469_v21 = vpop.f32.mrb[18].mxu1 }
 0x2f5   : > { %v3862_v24 = vadd.f32 %v2741_v17, %v1469_v21  ;;  %v2896_v25 = vpop.f32.mrb[19].mxu1  ;;  %v1473_v26 = vsel %vm940_vm4, %v3860_v19, -inf }
 0x2f6   : > { %1474 = vmax.xlane.f32.xlu1 %v1473_v26 }
 0x2f7   : > { %v1476_v27 = vsel %vm940_vm4, %v3862_v24, -inf }
 0x2f8   : > { %1477 = vmax.xlane.f32.xlu0 %v1476_v27 }
 0x2fa   : > { %v1589_v28 = vpop.f32.mrb[20].mxu1 }
 0x2fb   : > { %v3868_v29 = vadd.f32 %v2741_v17, %v1589_v28  ;;  %v2907_v30 = vpop.f32.mrb[21].mxu1 }
 0x2fc   : > { %v1592_v31 = vpop.f32.mrb[22].mxu1 }
 0x2fd   : > { %v3870_v32 = vadd.f32 %v2741_v17, %v1592_v31  ;;  %v2908_v33 = vpop.f32.mrb[23].mxu1  ;;  %v1596_v34 = vsel %vm940_vm4, %v3868_v29, -inf }
 0x2fe   : > { %1597 = vmax.xlane.f32.xlu1 %v1596_v34 }
 0x2ff   : > { %v1599_v35 = vsel %vm940_vm4, %v3870_v32, -inf }
 0x300   : > { %1600 = vmax.xlane.f32.xlu0 %v1599_v35 }
 0x302   : > { %v1712_v36 = vpop.f32.mrb[24].mxu1 }
 0x303   : > { %v3876_v37 = vadd.f32 %v2741_v17, %v1712_v36  ;;  %v2919_v38 = vpop.f32.mrb[25].mxu1 }
 0x304   : > { %v1715_v39 = vpop.f32.mrb[26].mxu1 }
 0x305   : > { %v3878_v40 = vadd.f32 %v2741_v17, %v1715_v39  ;;  %v2920_v41 = vpop.f32.mrb[27].mxu1  ;;  %v1719_v42 = vsel %vm940_vm4, %v3876_v37, -inf }
 0x306   : > { %1720 = vmax.xlane.f32.xlu1 %v1719_v42 }
 0x307   : > { %v1722_v43 = vsel %vm940_vm4, %v3878_v40, -inf }
 0x308   : > { %1723 = vmax.xlane.f32.xlu0 %v1722_v43 }
 0x30a   : > { %v1835_v44 = vpop.f32.mrb[28].mxu1 }
 0x30b   : > { %v3884_v45 = vadd.f32 %v2741_v17, %v1835_v44  ;;  %v2931_v46 = vpop.f32.mrb[29].mxu1 }
 0x30c   : > { %v1838_v47 = vpop.f32.mrb[30].mxu1 }
 0x30d   : > { %v3886_v48 = vadd.f32 %v2741_v17, %v1838_v47  ;;  %v2932_v50 = vpop.f32.mrb[31].mxu1  ;;  %v1842_v51 = vsel %vm940_vm4, %v3884_v45, -inf }
 0x30e   : > { %1843 = vmax.xlane.f32.xlu1 %v1842_v51 }
 0x30f   : > { %v1845_v53 = vsel %vm940_vm4, %v3886_v48, -inf }
 0x310   : > { %1846 = vmax.xlane.f32.xlu0 %v1845_v53 }
 0x31f   : > { %1212 = vrot.lane.b32.xlu1 %v3764_v23, %s3397_s26 }
 0x326   : > { %1089 = vrot.lane.b32.xlu0 %v3764_v23, %s3398_s15 }
 0x363   : > { %v943_v54 = vpop.xlane.xlu0 %942 }
 0x364   : > { %v947_v55 = vsub.f32 %v3825_v49, %v943_v54 }
 0x365   : > { %v946_v56 = vpop.xlane.xlu1 %945 }
 0x366   : > { %v949_v58 = vmul.f32 1.442695, %v947_v55  ;;  %v948_v59 = vsub.f32 %v3827_v52, %v946_v56 }
 0x368   : > { %3118 = vpow2.f32 %v949_v58  ;;  %v951_v61 = vmul.f32 1.442695, %v948_v59 }
 0x36a   : > { %3120 = vpow2.f32 %v951_v61 }
 0x36b   : > { %v1066_v62 = vpop.xlane.xlu0 %1065 }
 0x36c   : > { %v1070_v63 = vsub.f32 %v3833_v57, %v1066_v62 }
 0x36e   : > { %v1072_v0 = vmul.f32 1.442695, %v1070_v63 }
 0x36f   : > { %v1069_v2 = vpop.xlane.xlu0 %1068 }
 0x370   : > { %3122 = vpow2.f32 %v1072_v0  ;;  %v1071_v3 = vsub.f32 %v3835_v60, %v1069_v2 }
 0x372   : > { %v3900_v5 = vpop.eup %3118  ;;  %v1074_v6 = vmul.f32 1.442695, %v1071_v3 }
 0x373   : > { %v1189_v7 = vpop.xlane.xlu1 %1188  ;;  %v953_v49 = vsel %vm940_vm4, %v3900_v5, 0.0 }
 0x374   : > { %v3904_v8 = vpop.eup %3120  ;;  %3124 = vpow2.f32 %v1074_v6  ;;  %v1193_v52 = vsub.f32 %v3841_v1, %v1189_v7  ;;  %954 = vadd.xlane.f32.xlu1 %v953_v49 }
 0x375   : > { %v1192_v10 = vpop.xlane.xlu0 %1191  ;;  %v956_v57 = vsel %vm940_vm4, %v3904_v8, 0.0 }
 0x376   : > { %v1195_v11 = vmul.f32 1.442695, %v1193_v52  ;;  %v1194_v60 = vsub.f32 %v3843_v4, %v1192_v10  ;;  %957 = vadd.xlane.f32.xlu0 %v956_v57 }
 0x378   : > { %3126 = vpow2.f32 %v1195_v11  ;;  %v1197_v14 = vmul.f32 1.442695, %v1194_v60 }
 0x37a   : > { %v3910_v15 = vpop.eup %3122  ;;  %3128 = vpow2.f32 %v1197_v14 }
 0x37b   : > { %v1312_v16 = vpop.xlane.xlu1 %1311  ;;  %v1076_v17 = vsel %vm940_vm4, %v3910_v15, 0.0 }
 0x37c   : > { %v1316_v1 = vsub.f32 %v3849_v9, %v1312_v16  ;;  %1077 = vadd.xlane.f32.xlu1 %v1076_v17 }
 0x37d   : > { %v1315_v18 = vpop.xlane.xlu0 %1314 }
 0x37e   : > { %v3915_v20 = vpop.eup %3124  ;;  %v1318_v21 = vmul.f32 1.442695, %v1316_v1  ;;  %v1317_v25 = vsub.f32 %v3851_v13, %v1315_v18 }
 0x37f   : > { %v1079_v4 = vsel %vm940_vm4, %v3915_v20, 0.0 }
 0x380   : > { %3130 = vpow2.f32 %v1318_v21  ;;  %v1320_v26 = vmul.f32 1.442695, %v1317_v25  ;;  %1080 = vadd.xlane.f32.xlu0 %v1079_v4 }
 0x382   : > { %v3920_v27 = vpop.eup %3126  ;;  %3132 = vpow2.f32 %v1320_v26 }
 0x383   : > { %v1475_v28 = vpop.xlane.xlu1 %1474  ;;  %v1199_v9 = vsel %vm940_vm4, %v3920_v27, 0.0 }
 0x384   : > { %v3924_v30 = vpop.eup %3128  ;;  %v1479_v31 = vsub.f32 %v3860_v19, %v1475_v28  ;;  %1200 = vadd.xlane.f32.xlu1 %v1199_v9 }
 0x385   : > { %v1478_v33 = vpop.xlane.xlu0 %1477  ;;  %v1202_v13 = vsel %vm940_vm4, %v3924_v30, 0.0 }
 0x386   : > { %v1481_v34 = vmul.f32 1.442695, %v1479_v31  ;;  %v1480_v35 = vsub.f32 %v3862_v24, %v1478_v33  ;;  %1203 = vadd.xlane.f32.xlu0 %v1202_v13 }
 0x388   : > { %3134 = vpow2.f32 %v1481_v34  ;;  %v1483_v36 = vmul.f32 1.442695, %v1480_v35 }
 0x38a   : > { %v3930_v38 = vpop.eup %3130  ;;  %3136 = vpow2.f32 %v1483_v36 }
 0x38b   : > { %v1598_v39 = vpop.xlane.xlu1 %1597  ;;  %v1322_v41 = vsel %vm940_vm4, %v3930_v38, 0.0 }
 0x38c   : > { %v3934_v42 = vpop.eup %3132  ;;  %v1602_v19 = vsub.f32 %v3868_v29, %v1598_v39  ;;  %1323 = vadd.xlane.f32.xlu1 %v1322_v41 }
 0x38d   : > { %v1601_v43 = vpop.xlane.xlu0 %1600  ;;  %v1325_v44 = vsel %vm940_vm4, %v3934_v42, 0.0 }
 0x38e   : > { %v1604_v24 = vmul.f32 1.442695, %v1602_v19  ;;  %v1603_v46 = vsub.f32 %v3870_v32, %v1601_v43  ;;  %1326 = vadd.xlane.f32.xlu0 %v1325_v44 }
 0x390   : > { %3138 = vpow2.f32 %v1604_v24  ;;  %v1606_v47 = vmul.f32 1.442695, %v1603_v46 }
 0x392   : > { %v3940_v50 = vpop.eup %3134  ;;  %3140 = vpow2.f32 %v1606_v47 }
 0x393   : > { %v1721_v51 = vpop.xlane.xlu1 %1720  ;;  %v1485_v53 = vsel %vm940_vm4, %v3940_v50, 0.0 }
 0x394   : > { %v3944_v54 = vpop.eup %3136  ;;  %v1725_v29 = vsub.f32 %v3876_v37, %v1721_v51  ;;  %1486 = vadd.xlane.f32.xlu0 %v1485_v53 }
 0x395   : > { %v1724_v55 = vpop.xlane.xlu0 %1723  ;;  %v1488_v32 = vsel %vm940_vm4, %v3944_v54, 0.0 }
 0x396   : > { %v1727_v56 = vmul.f32 1.442695, %v1725_v29  ;;  %v1726_v58 = vsub.f32 %v3878_v40, %v1724_v55 }
 0x398   : > { %3142 = vpow2.f32 %v1727_v56  ;;  %v1729_v59 = vmul.f32 1.442695, %v1726_v58  ;;  %1489 = vadd.xlane.f32.xlu0 %v1488_v32 }
 0x39a   : > { %v3950_v61 = vpop.eup %3138  ;;  %3144 = vpow2.f32 %v1729_v59 }
 0x39b   : > { %v1844_v62 = vpop.xlane.xlu1 %1843  ;;  %v1608_v63 = vsel %vm940_vm4, %v3950_v61, 0.0 }
 0x39c   : > { %v3954_v0 = vpop.eup %3140  ;;  %v1848_v37 = vsub.f32 %v3884_v45, %v1844_v62  ;;  %1609 = vadd.xlane.f32.xlu1 %v1608_v63 }
 0x39d   : > { %v1611_v40 = vsel %vm940_vm4, %v3954_v0, 0.0  ;;  %v1847_v10 = vpop.xlane.xlu0 %1846 }
 0x39e   : > { %v1850_v2 = vmul.f32 1.442695, %v1848_v37  ;;  %1612 = vadd.xlane.f32.xlu0 %v1611_v40  ;;  %v1849_v57 = vsub.f32 %v3886_v48, %v1847_v10 }
 0x39f   : > { %v1213_v48 = vpop.permute.xlu1 %1212 }
 0x3a0   : > { %3146 = vpow2.f32 %v1850_v2  ;;  %v1852_v11 = vmul.f32 1.442695, %v1849_v57 }
 0x3a1   : > { %v1090_v14 = vpop.permute.xlu0 %1089 }
 0x3a2   : > { %v3959_v3 = vpop.eup %3142  ;;  %3148 = vpow2.f32 %v1852_v11 }
 0x3a3   : > { %v1731_v6 = vsel %vm940_vm4, %v3959_v3, 0.0 }
 0x3a4   : > { %v3963_v7 = vpop.eup %3144  ;;  %1732 = vadd.xlane.f32.xlu0 %v1731_v6 }
 0x3a5   : > { %v1734_v49 = vsel %vm940_vm4, %v3963_v7, 0.0 }
 0x3a8   : > { %1735 = vadd.xlane.f32.xlu0 %v1734_v49 }
 0x3aa   : > { %v3967_v45 = vpop.eup %3146 }
 0x3ab   : > { %v1854_v52 = vsel %vm940_vm4, %v3967_v45, 0.0 }
 0x3ac   : > { %1855 = vadd.xlane.f32.xlu0 %v1854_v52  ;;  %v3979_v60 = vpop.eup %3148 }
 0x3ad   : > { %1335 = vrot.lane.b32.xlu1 %v3764_v23, %s3399_s14  ;;  %v1857_v23 = vsel %vm940_vm4, %v3979_v60, 0.0 }
 0x3c2   : > { %1498 = vrot.lane.b32.xlu0 %v3762_v22, %s3396_s16  ;;  %s4295_s16 = scalar_lea.vmem %s4221_s5, %s3692_s10 }
 0x3c6   : > { %1621 = vrot.lane.b32.xlu0 %v3762_v22, %s3398_s15  ;;  %s4299_s15 = scalar_lea.vmem [#allocation2], %s3673_s0 }
 0x3ca   : > { %1744 = vrot.lane.b32.xlu0 %v3762_v22, %s3397_s26  ;;  %s4298_s26 = scalar_lea.vmem %s4224_s8, %s3692_s10  ;;  %s3403_s10 = smov [#allocation8]  }
 0x3ce   : > { %1867 = vrot.lane.b32.xlu0 %v3762_v22, %s3399_s14  ;;  %s2402_s14 = sshll.u32 %s3403_s10, 4  ;;  %s2403_s14 = int_to_ptr.vmem [resolvable:$true] %s2402_s14 }
 0x3cf   : > { %p3299_p11 = scmp.lt.s32.totalorder %s2403_s14, %s2403_s14 }
 0x3d1   : > { %1858 = vadd.xlane.f32.xlu1 %v1857_v23 }
 0x401   : > { %v955_v16 = vpop.xlane.xlu1 %954 }
 0x402   : > { %3150 = vrcp.f32 %v955_v16 }
 0x403   : > { %v958_v17 = vpop.xlane.xlu0 %957 }
 0x404   : > { %3152 = vrcp.f32 %v958_v17 }
 0x409   : > { %v1078_v1 = vpop.xlane.xlu1 %1077 }
 0x40a   : > { %3154 = vrcp.f32 %v1078_v1 }
 0x40c   : > { %v3151_v18 = vpop.eup %3150 }
 0x40d   : > { %v1081_v21 = vpop.xlane.xlu0 %1080  ;;  %v961_v4 = vmul.f32 %v3151_v18, %v3900_v5 }
 0x40e   : > { %v3153_v25 = vpop.eup %3152  ;;  %3156 = vrcp.f32 %v1081_v21 }
 0x40f   : > { %v962_v22 = vmul.f32 %v3153_v25, %v3904_v8 }
 0x411   : > { %v1201_v26 = vpop.xlane.xlu1 %1200  ;;  %v965_v28 = vpack.c.bf16 %v962_v22, %v961_v4 }
 0x412   : > { %3158 = vrcp.f32 %v1201_v26 }
 0x413   : > { %2852 = vmatmul.mubr.msk.bf16.vlgmr.msra.gmra.mrb[4].mxu0 %vm940_vm4, %v965_v28  ;;  %v1204_v9 = vpop.xlane.xlu0 %1203 }
 0x414   : > { %2862 = vmatpush3.bf16.msra.mxu0 %v1090_v14  ;;  %3160 = vrcp.f32 %v1204_v9  ;;  %2863 = vmatprep.mubr.msk.bf16.mxu0 %vm3388_vm2, %v3387_v12  ;;  %v3155_v31 = vpop.eup %3154 }
 0x415   : > { %2873 = vmatprep.subr.bf16.mxu0 %v3387_v12  ;;  %v1084_v13 = vmul.f32 %v3155_v31, %v3910_v15 }
 0x418   : > { %v3157_v33 = vpop.eup %3156 }
 0x419   : > { %v1085_v5 = vmul.f32 %v3157_v33, %v3915_v20  ;;  %v1324_v8 = vpop.xlane.xlu1 %1323  ;;  %v1086_v20 = vadd.f32 %v1084_v13, %v961_v4 }
 0x41a   : > { %3162 = vrcp.f32 %v1324_v8 }
 0x41b   : > { %v1327_v34 = vpop.xlane.xlu0 %1326  ;;  %v1088_v35 = vpack.c.bf16 %v1085_v5, %v1084_v13  ;;  %v1087_v24 = vadd.f32 %v1085_v5, %v962_v22 }
 0x41c   : > { %3164 = vrcp.f32 %v1327_v34  ;;  %v3159_v36 = vpop.eup %3158 }
 0x41d   : > { %2864 = vmatmul.mubr.msk.bf16.vlgmr.msra.gmra.mrb[8].mxu0 %vm940_vm4, %v1088_v35  ;;  %v1207_v15 = vmul.f32 %v3159_v36, %v3920_v27 }
 0x41e   : > { %v3161_v39 = vpop.eup %3160  ;;  %2874 = vmatpush3.bf16.msra.mxu0 %v1213_v48  ;;  %2875 = vmatprep.mubr.msk.bf16.mxu0 %vm3388_vm2, %v3387_v12 }
 0x41f   : > { %v1208_v41 = vmul.f32 %v3161_v39, %v3924_v30  ;;  %2885 = vmatprep.subr.bf16.mxu0 %v3387_v12  ;;  %v1209_v46 = vadd.f32 %v1207_v15, %v1086_v20 }
 0x421   : > { %v1487_v19 = vpop.xlane.xlu0 %1486  ;;  %v1211_v43 = vpack.c.bf16 %v1208_v41, %v1207_v15  ;;  %v1210_v30 = vadd.f32 %v1208_v41, %v1087_v24 }
 0x424   : > { %v3163_v44 = vpop.eup %3162 }
 0x425   : > { %v1330_v47 = vmul.f32 %v3163_v44, %v3930_v38  ;;  %2876 = vmatmul.mubr.msk.bf16.vlgmr.msra.gmra.mrb[12].mxu0 %vm940_vm4, %v1211_v43  ;;  %v1490_v56 = vpop.xlane.xlu0 %1489 }
 0x426   : > { %v3165_v51 = vpop.eup %3164  ;;  %2887 = vmatprep.mubr.msk.bf16.mxu0 %vm3388_vm2, %v3387_v12  ;;  %3166 = vrcp.f32 %v1490_v56 }
 0x427   : > { %v1332_v53 = vadd.f32 %v1330_v47, %v1209_v46  ;;  %v1331_v27 = vmul.f32 %v3165_v51, %v3934_v42  ;;  %3168 = vrcp.f32 %v1487_v19 }
 0x429   : > { %v1382_v29 = vmul.f32 0.25, %v1332_v53  ;;  %v1333_v55 = vadd.f32 %v1331_v27, %v1210_v30  ;;  %v1610_v58 = vpop.xlane.xlu1 %1609  ;;  %v1334_v62 = vpack.c.bf16 %v1331_v27, %v1330_v47 }
 0x42a   : > { %3170 = vrcp.f32 %v1610_v58 }
 0x42b   : > { %1384 = vst.msk [vmem:[%s3734_s25] sm:$0xff] %vm940_vm4, %v1382_v29  ;;  %v1383_v32 = vmul.f32 0.25, %v1333_v55  ;;  %v1613_v38 = vpop.xlane.xlu0 %1612 }
 0x42d   : > { %1385 = vst.msk [vmem:[%s3734_s25 + $0x8] sm:$0xff] %vm940_vm4, %v1383_v32  ;;  %v1336_v59 = vpop.permute.xlu1 %1335 }
 0x42e   : > { %2886 = vmatpush3.bf16.msra.mxu0 %v1336_v59  ;;  %v3110_v59 = vld [vmem:[%s3705_s13] sm:$0xff]  }
 0x42f   : > { %2897 = vmatprep.subr.bf16.mxu0 %v3387_v12  ;;  %2939 = vmatprep.subr.bf16.mxu1 %v3110_v59 }
 0x430   : > { %v3167_v37 = vpop.eup %3166  ;;  %2940 = vmatpush3.bf16.msra.mxu1 %v3110_v59 }
 0x431   : > { %2888 = vmatmul.mubr.msk.bf16.vlgmr.msra.gmra.mrb[16].mxu0 %vm940_vm4, %v1334_v62  ;;  %v1733_v42 = vpop.xlane.xlu0 %1732  ;;  %v3169_v2 = vpop.eup %3168  ;;  %v1494_v6 = vmul.f32 %v3167_v37, %v3944_v54 }
 0x432   : > { %2899 = vmatprep.mubr.msk.bf16.mxu0 %vm3388_vm2, %v3387_v12  ;;  %3172 = vrcp.f32 %v1733_v42  ;;  %v1493_v52 = vmul.f32 %v3169_v2, %v3940_v50 }
 0x433   : > { %3174 = vrcp.f32 %v1613_v38 }
 0x434   : > { %v3171_v49 = vpop.eup %3170  ;;  %v1497_v23 = vpack.c.bf16 %v1494_v6, %v1493_v52 }
 0x435   : > { %v1736_v63 = vpop.xlane.xlu0 %1735  ;;  %v1616_v11 = vmul.f32 %v3171_v49, %v3950_v61  ;;  %v3111_v49 = vld [vmem:[%s3705_s13 + $0x8] sm:$0xff]  }
 0x436   : > { %2941 = vmatprep.subr.bf16.mxu1 %v3111_v49 }
 0x437   : > { %v1618_v50 = vadd.f32 %v1616_v11, %v1493_v52  ;;  %2942 = vmatpush3.bf16.msra.mxu1 %v3111_v49 }
 0x439   : > { %v1856_v40 = vpop.xlane.xlu0 %1855 }
 0x43a   : > { %3176 = vrcp.f32 %v1856_v40 }
 0x43b   : > { %3178 = vrcp.f32 %v1736_v63 }
 0x43c   : > { %v3173_v57 = vpop.eup %3172 }
 0x43d   : > { %v1499_v10 = vpop.permute.xlu0 %1498  ;;  %v3175_v48 = vpop.eup %3174  ;;  %v1739_v14 = vmul.f32 %v3173_v57, %v3959_v3 }
 0x43e   : > { %2898 = vmatpush3.bf16.msra.mxu0 %v1499_v10  ;;  %v1617_v54 = vmul.f32 %v3175_v48, %v3954_v0 }
 0x43f   : > { %2909 = vmatprep.subr.bf16.mxu0 %v3387_v12  ;;  %v1741_v17 = vadd.f32 %v1739_v14, %v1618_v50 }
 0x440   : > { %v1620_v21 = vpack.c.bf16 %v1617_v54, %v1616_v11  ;;  %v1619_v28 = vadd.f32 %v1617_v54, %v1494_v6 }
 0x441   : > { %2900 = vmatmul.mubr.msk.bf16.vlgmr.msra.gmra.mrb[20].mxu0 %vm940_vm4, %v1497_v23  ;;  %v1622_v16 = vpop.permute.xlu0 %1621 }
 0x442   : > { %2910 = vmatpush3.bf16.msra.mxu0 %v1622_v16  ;;  %2911 = vmatprep.mubr.msk.bf16.mxu0 %vm3388_vm2, %v3387_v12 }
 0x443   : > { %2921 = vmatprep.subr.bf16.mxu0 %v3387_v12 }
 0x444   : > { %v3177_v61 = vpop.eup %3176 }
 0x445   : > { %v1862_v1 = vmul.f32 %v3177_v61, %v3967_v45  ;;  %v3179_v3 = vpop.eup %3178  ;;  %v1745_v4 = vpop.permute.xlu0 %1744 }
 0x446   : > { %v1740_v22 = vmul.f32 %v3179_v3, %v3963_v7 }
 0x447   : > { %v1864_v18 = vadd.f32 %v1862_v1, %v1741_v17 }
 0x448   : > { %v1743_v0 = vpack.c.bf16 %v1740_v22, %v1739_v14  ;;  %v1742_v31 = vadd.f32 %v1740_v22, %v1619_v28 }
 0x449   : > { %v1914_v25 = vmul.f32 0.25, %v1864_v18  ;;  %2912 = vmatmul.mubr.msk.bf16.vlgmr.msra.gmra.mrb[24].mxu0 %vm940_vm4, %v1620_v21  ;;  %v1868_v45 = vpop.permute.xlu0 %1867 }
 0x44a   : > { %2922 = vmatpush3.bf16.msra.mxu0 %v1745_v4  ;;  %2923 = vmatprep.mubr.msk.bf16.mxu0 %vm3388_vm2, %v3387_v12 }
 0x44b   : > { %2750 = vst.msk [vmem:[%s3734_s25 + $0x10] sm:$0xff] %vm940_vm4, %v1914_v25  ;;  %2933 = vmatprep.subr.bf16.mxu0 %v3387_v12 }
 0x451   : > { %2924 = vmatmul.mubr.msk.bf16.vlgmr.msra.gmra.mrb[28].mxu0 %vm940_vm4, %v1743_v0 }
 0x452   : > { %2934 = vmatpush3.bf16.msra.mxu0 %v1868_v45  ;;  %2935 = vmatprep.mubr.msk.bf16.mxu0 %vm3388_vm2, %v3387_v12 }
 0x45e   : > { %v1859_v26 = vpop.xlane.xlu1 %1858 }
 0x45f   : > { %3180 = vrcp.f32 %v1859_v26 }
 0x469   : > { %v3181_v9 = vpop.eup %3180 }
 0x46a   : > { %v1863_v7 = vmul.f32 %v3181_v9, %v3979_v60 }
 0x46c   : > { %v1865_v33 = vadd.f32 %v1863_v7, %v1742_v31  ;;  %v1866_v13 = vpack.c.bf16 %v1863_v7, %v1862_v1 }
 0x46e   : > { %v1915_v5 = vmul.f32 0.25, %v1865_v33  ;;  %2936 = vmatmul.mubr.msk.bf16.vlgmr.msra.gmra.mrb[32].mxu0 %vm940_vm4, %v1866_v13 }
 0x470   : > { %2751 = vst.msk [vmem:[%s3734_s25 + $0x18] sm:$0xff] %vm940_vm4, %v1915_v5 }
 0x4e6   : > { %v4036_v8 = vpop.f32.mrb[4].mxu0 }
 0x4e7   : > { %v2853_v34 = vpop.f32.mrb[5].mxu0 }
 0x4e8   : > { %v1009_v35 = vpop.f32.mrb[6].mxu0 }
 0x4e9   : > { %v2854_v36 = vpop.f32.mrb[7].mxu0 }
 0x4f0   : > { %v1129_v12 = vpop.f32.mrb[8].mxu0 }
 0x4f1   : > { %v2865_v39 = vpop.f32.mrb[9].mxu0 }
 0x4f2   : > { %v1132_v41 = vpop.f32.mrb[10].mxu0 }
 0x4f3   : > { %v3078_v15 = vpack.i.bf16 %v1132_v41, %v1129_v12  ;;  %v2866_v20 = vpop.f32.mrb[11].mxu0 }
 0x4f4   : > { %v2752_v20 = vld [vmem:[%s4295_s16] ss:$0 sm:$0xff] }
 0x4f5   : > { %3079 = vrot.lane.b32.xlu0 %v3078_v15, %s3400_s28 }
 0x4f8   : > { %v1252_v60 = vpop.f32.mrb[12].mxu0 }
 0x4f9   : > { %v2877_v19 = vpop.f32.mrb[13].mxu0 }
 0x4fa   : > { %v1255_v43 = vpop.f32.mrb[14].mxu0 }
 0x4fb   : > { %v3083_v44 = vpack.i.bf16 %v1255_v43, %v1252_v60  ;;  %v2878_v24 = vpop.f32.mrb[15].mxu0 }
 0x4fd   : > { %3084 = vrot.lane.b32.xlu1 %v3083_v44, %s3401_s22 }
 0x504   : > { %v1375_v46 = vpop.f32.mrb[16].mxu0 }
 0x505   : > { %v2889_v47 = vpop.f32.mrb[17].mxu0 }
 0x506   : > { %v1378_v51 = vpop.f32.mrb[18].mxu0 }
 0x507   : > { %v3088_v30 = vpack.i.bf16 %v1378_v51, %v1375_v46  ;;  %v2890_v53 = vpop.f32.mrb[19].mxu0  ;;  %v3198_v46 = vld [vmem:[#allocation8 + $0x10] sm:$0xff] }
 0x508   : > { %v3199_v53 = vld [vmem:[#allocation8] sm:$0xff] }
 0x509   : > { %3089 = vrot.lane.b32.xlu0 %v3088_v30, %s3402_s20 }
 0x514   : > { %v1538_v27 = vpop.f32.mrb[20].mxu0 }
 0x515   : > { %v2901_v29 = vpop.f32.mrb[21].mxu0 }
 0x516   : > { %v1541_v55 = vpop.f32.mrb[22].mxu0 }
 0x517   : > { %v2902_v56 = vpop.f32.mrb[23].mxu0 }
 0x518   : > { %v3200_v56 = vld [vmem:[#allocation8 + $0x18] sm:$0xff] }
 0x51c   : > { %v1661_v58 = vpop.f32.mrb[24].mxu0 }
 0x51d   : > { %v2913_v32 = vpop.f32.mrb[25].mxu0 }
 0x51e   : > { %v1664_v38 = vpop.f32.mrb[26].mxu0  ;;  %v3201_v32 = vld [vmem:[#allocation8 + $0x8] sm:$0xff] }
 0x51f   : > { %v3093_v62 = vpack.i.bf16 %v1664_v38, %v1661_v58  ;;  %v2914_v42 = vpop.f32.mrb[27].mxu0 }
 0x521   : > { %3094 = vrot.lane.b32.xlu0 %v3093_v62, %s3400_s28 }
 0x524   : > { %v1784_v63 = vpop.f32.mrb[28].mxu0 }
 0x525   : > { %v2925_v37 = vpop.f32.mrb[29].mxu0 }
 0x526   : > { %v1787_v40 = vpop.f32.mrb[30].mxu0 }
 0x527   : > { %v3098_v2 = vpack.i.bf16 %v1787_v40, %v1784_v63  ;;  %v2926_v6 = vpop.f32.mrb[31].mxu0 }
 0x529   : > { %3099 = vrot.lane.b32.xlu0 %v3098_v2, %s3401_s22  ;;  %s3292_s22 = scalar_lea.vmem %s2403_s14, 512 }
 0x52a   : > { %p3293_p7 = scmp.ne.s32.totalorder %s2403_s14, %s3292_s22  ;;  %p3300_p10 = scmp.lt.s32.totalorder %s3292_s22, %s3292_s22 }
 0x52c   : > { %p3294_p12 = pnand %p3293_p7, %p4300_p6  ;;  %p3301_p0 = por %p3300_p10, %p3299_p11 }
 0x52e   : > { %p3295_p9 = pneg %p3294_p12 }
 0x530   : > { %p3302_p8 = pnand %p3301_p0, %p3295_p9 }
 0x541   : > { %v1907_v52 = vpop.f32.mrb[32].mxu0 }
 0x542   : > { %v2937_v10 = vpop.f32.mrb[33].mxu0 }
 0x543   : > { %v1910_v57 = vpop.f32.mrb[34].mxu0 }
 0x544   : > { %v3103_v11 = vpack.i.bf16 %v1910_v57, %v1907_v52  ;;  %v2938_v23 = vpop.f32.mrb[35].mxu0  ;;  %v3112_v57 = vld [vmem:[%s3683_s17] sm:$0xff]  }
 0x545   : > { %2947 = vmatprep.subr.bf16.mxu0 %v3112_v57  ;;  %v3114_v23 = vld [vmem:[%s3731_s27] sm:$0xff]  }
 0x546   : > { %3104 = vrot.lane.b32.xlu0 %v3103_v11, %s3402_s20  ;;  %v3113_v11 = vld [vmem:[%s3683_s17 + $0x8] sm:$0xff]   ;;  %2948 = vmatpush3.bf16.msra.mxu0 %v3112_v57 }
 0x547   : > { %2949 = vmatprep.subr.bf16.mxu0 %v3113_v11  ;;  %2955 = vmatprep.subr.bf16.mxu1 %v3114_v23 }
 0x54a   : > { %2950 = vmatpush3.bf16.msra.mxu0 %v3113_v11 }
 0x567   : > { %v3080_v48 = vpop.permute.xlu0 %3079 }
 0x568   : > { %v3082_v16 = vunpack.i.h.bf16 %v3080_v48  ;;  %v3081_v50 = vunpack.i.l.bf16 %v3080_v48  ;;  %v3115_v48 = vld [vmem:[%s3731_s27 + $0x8] sm:$0xff]  }
 0x56a   : > { %v1411_v1 = vsel %vm892_vm3, %v1009_v35, %v3082_v16  ;;  %v1410_v18 = vsel %vm892_vm3, %v4036_v8, %v3081_v50 }
 0x56f   : > { %v3085_v14 = vpop.permute.xlu1 %3084 }
 0x570   : > { %v3087_v54 = vunpack.i.h.bf16 %v3085_v14  ;;  %v3086_v61 = vunpack.i.l.bf16 %v3085_v14 }
 0x572   : > { %v1412_v25 = vsel %vm940_vm4, %v1410_v18, %v3086_v61  ;;  %v1413_v4 = vsel %vm940_vm4, %v1411_v1, %v3087_v54 }
 0x57b   : > { %v3090_v17 = vpop.permute.xlu0 %3089 }
 0x57c   : > { %v3092_v21 = vunpack.i.h.bf16 %v3090_v17  ;;  %v3091_v3 = vunpack.i.l.bf16 %v3090_v17 }
 0x57e   : > { %v1415_v22 = vsel %vm1414_vm5, %v1412_v25, %v3091_v3  ;;  %v1416_v0 = vsel %vm1414_vm5, %v1413_v4, %v3092_v21 }
 0x57f   : > { %v1949_v45 = vpack.c.bf16 %v1416_v0, %v1415_v22 }
 0x581   : > { %2943 = vmatprep.mubr.msk.bf16.mxu1 %vm827_vm1, %v1949_v45 }
 0x593   : > { %v3095_v26 = vpop.permute.xlu0 %3094 }
 0x594   : > { %v3097_v9 = vunpack.i.h.bf16 %v3095_v26  ;;  %v3096_v31 = vunpack.i.l.bf16 %v3095_v26 }
 0x596   : > { %v1944_v5 = vsel %vm892_vm3, %v1541_v55, %v3097_v9  ;;  %v1943_v8 = vsel %vm892_vm3, %v1538_v27, %v3096_v31 }
 0x59b   : > { %v3100_v28 = vpop.permute.xlu0 %3099 }
 0x59c   : > { %v3102_v7 = vunpack.i.h.bf16 %v3100_v28  ;;  %v3101_v33 = vunpack.i.l.bf16 %v3100_v28 }
 0x59e   : > { %v1945_v36 = vsel %vm940_vm4, %v1943_v8, %v3101_v33  ;;  %v1946_v12 = vsel %vm940_vm4, %v1944_v5, %v3102_v7 }
 0x5b8   : > { %v3105_v13 = vpop.permute.xlu0 %3104 }
 0x5b9   : > { %v3107_v34 = vunpack.i.h.bf16 %v3105_v13  ;;  %v3106_v35 = vunpack.i.l.bf16 %v3105_v13 }
 0x5bb   : > { %v1947_v39 = vsel %vm1414_vm5, %v1945_v36, %v3106_v35  ;;  %v1948_v41 = vsel %vm1414_vm5, %v1946_v12, %v3107_v34 }
 0x5bc   : > { %v1950_v15 = vpack.c.bf16 %v1948_v41, %v1947_v39 }
 0x5be   : > { %2944 = vmatmul.mubr.msk.bf16.vlgmr.msra.gmra.mrb[32].mxu1 %vm827_vm1, %v1950_v15 }
 0x5bf   : > { %2956 = vmatpush3.bf16.msra.mxu1 %v3114_v23 }
 0x5c0   : > { %2957 = vmatprep.subr.bf16.mxu1 %v3115_v48 }
 0x5c3   : > { %2958 = vmatpush3.bf16.msra.mxu1 %v3115_v48 }
 0x691   : > { %v2945_v60 = vpop.f32.mrb[32].mxu1 }
 0x692   : > { %v2023_v19 = vadd.f32 %v2945_v60, %v2752_v20  ;;  %v2014_v43 = vpop.f32.mrb[33].mxu1 }
 0x693   : > { %v2015_v44 = vadd.f32 %v2752_v20, %v2014_v43  ;;  %v2946_v24 = vpop.f32.mrb[34].mxu1  ;;  %v2758_v43 = vld [vmem:[%s4296_s23] ss:$0 sm:$0xff] }
 0x694   : > { %v4062_v47 = vadd.f32 %v3198_v46, %v2023_v19  ;;  %v2026_v51 = vadd.f32 %v2946_v24, %v2752_v20  ;;  %v2017_v30 = vpop.f32.mrb[35].mxu1 }
 0x695   : > { %v4064_v27 = vadd.f32 %v3199_v53, %v2015_v44  ;;  %v2018_v29 = vadd.f32 %v2752_v20, %v2017_v30  ;;  %v2757_v20 = vld [vmem:[%s767_s11] ss:$0 sm:$0xff] }
 0x696   : > { %v2041_v55 = vsel %vm827_vm1, %v4062_v47, 0.0  ;;  %v4068_v58 = vadd.f32 %v3200_v56, %v2026_v51  ;;  %v2054_v2 = vmul.f32 %v4062_v47, %v4062_v47 }
 0x697   : > { %v4070_v38 = vadd.f32 %v3201_v32, %v2018_v29  ;;  %2042 = vadd.xlane.f32.xlu0 %v2041_v55  ;;  %v2035_v59 = vsel %vm827_vm1, %v4064_v27, 0.0  ;;  %v2052_v42 = vmul.f32 %v4064_v27, %v4064_v27 }
 0x698   : > { %2036 = vadd.xlane.f32.xlu1 %v2035_v59  ;;  %v2044_v63 = vsel %vm827_vm1, %v4068_v58, 0.0  ;;  %v2055_v49 = vmul.f32 %v4068_v58, %v4068_v58  ;;  %v2062_v52 = vsel %vm827_vm1, %v2054_v2, 0.0 }
 0x699   : > { %v2038_v62 = vsel %vm827_vm1, %v4070_v38, 0.0  ;;  %v2053_v37 = vmul.f32 %v4070_v38, %v4070_v38  ;;  %v2056_v40 = vsel %vm827_vm1, %v2052_v42, 0.0 }
 0x69a   : > { %v2065_v10 = vsel %vm827_vm1, %v2055_v49, 0.0 }
 0x69b   : > { %2039 = vadd.xlane.f32.xlu0 %v2038_v62  ;;  %v2059_v6 = vsel %vm827_vm1, %v2053_v37, 0.0  ;;  %v3116_v37 = vld [vmem:[%s3731_s27 + $0x10] sm:$0xff]  }
 0x69c   : > { %2045 = vadd.xlane.f32.xlu1 %v2044_v63  ;;  %2959 = vmatprep.subr.bf16.mxu1 %v3116_v37 }
 0x69d   : > { %2960 = vmatpush3.bf16.msra.mxu1 %v3116_v37 }
 0x69f   : > { %2057 = vadd.xlane.f32.xlu0 %v2056_v40  ;;  %v2759_v40 = vld [vmem:[%s640_s9] ss:$0 sm:$0xff] }
 0x6a0   : > { %2060 = vadd.xlane.f32.xlu1 %v2059_v6 }
 0x6a3   : > { %2063 = vadd.xlane.f32.xlu0 %v2062_v52 }
 0x6a4   : > { %2066 = vadd.xlane.f32.xlu1 %v2065_v10 }
 0x724   : > { %v2043_v14 = vpop.xlane.xlu0 %2042 }
 0x725   : > { %v2037_v16 = vpop.xlane.xlu1 %2036  ;;  %v2050_v18 = vmul.f32 0.03125, %v2043_v14 }
 0x726   : > { %v2048_v54 = vmul.f32 0.03125, %v2037_v16 }
 0x727   : > { %v2074_v9 = vmul.f32 %v2050_v18, %v2050_v18  ;;  %v2082_v24 = vsub.f32 %v4062_v47, %v2050_v18 }
 0x728   : > { %v2040_v50 = vpop.xlane.xlu0 %2039  ;;  %v2072_v21 = vmul.f32 %v2048_v54, %v2048_v54  ;;  %v2080_v39 = vsub.f32 %v4064_v27, %v2048_v54 }
 0x729   : > { %v2046_v61 = vpop.xlane.xlu1 %2045  ;;  %v2049_v17 = vmul.f32 0.03125, %v2040_v50 }
 0x72a   : > { %v2051_v22 = vmul.f32 0.03125, %v2046_v61 }
 0x72b   : > { %v2073_v4 = vmul.f32 %v2049_v17, %v2049_v17  ;;  %v2081_v15 = vsub.f32 %v4070_v38, %v2049_v17  ;;  %v2764_v17 = vld [vmem:[%s781_s4] ss:$0 sm:$0xff] }
 0x72c   : > { %v2058_v1 = vpop.xlane.xlu0 %2057  ;;  %v2075_v13 = vmul.f32 %v2051_v22, %v2051_v22  ;;  %v2083_v30 = vsub.f32 %v4068_v58, %v2051_v22  ;;  %v3117_v58 = vld [vmem:[%s3731_s27 + $0x18] sm:$0xff]  }
 0x72d   : > { %v2068_v3 = vmul.f32 0.03125, %v2058_v1  ;;  %v2061_v25 = vpop.xlane.xlu1 %2060  ;;  %2961 = vmatprep.subr.bf16.mxu1 %v3117_v58 }
 0x72e   : > { %v2069_v0 = vmul.f32 0.03125, %v2061_v25  ;;  %2962 = vmatpush3.bf16.msra.mxu1 %v3117_v58 }
 0x72f   : > { %v2076_v45 = vsub.f32 %v2068_v3, %v2072_v21 }
 0x730   : > { %v2077_v26 = vsub.f32 %v2069_v0, %v2073_v4  ;;  %v2064_v28 = vpop.xlane.xlu0 %2063 }
 0x731   : > { %v2084_v31 = vadd.f32 1e-05, %v2076_v45  ;;  %v2070_v7 = vmul.f32 0.03125, %v2064_v28  ;;  %v2067_v33 = vpop.xlane.xlu1 %2066 }
 0x732   : > { %v2085_v5 = vadd.f32 1e-05, %v2077_v26  ;;  %v2071_v8 = vmul.f32 0.03125, %v2067_v33 }
 0x733   : > { %3182 = vrsqrt.f32 %v2084_v31  ;;  %v2078_v34 = vsub.f32 %v2070_v7, %v2074_v9 }
 0x734   : > { %3184 = vrsqrt.f32 %v2085_v5  ;;  %v2079_v35 = vsub.f32 %v2071_v8, %v2075_v13 }
 0x735   : > { %v2086_v36 = vadd.f32 1e-05, %v2078_v34 }
 0x736   : > { %v2087_v12 = vadd.f32 1e-05, %v2079_v35 }
 0x737   : > { %3186 = vrsqrt.f32 %v2086_v36 }
 0x738   : > { %3188 = vrsqrt.f32 %v2087_v12 }
 0x73d   : > { %v3183_v41 = vpop.eup %3182 }
 0x73e   : > { %v3185_v60 = vpop.eup %3184  ;;  %v2092_v19 = vmul.f32 %v3183_v41, %v2080_v39 }
 0x73f   : > { %v2093_v44 = vmul.f32 %v3185_v60, %v2081_v15 }
 0x740   : > { %v2102_v46 = vmul.f32 %v2757_v20, %v2092_v19 }
 0x741   : > { %v3187_v51 = vpop.eup %3186  ;;  %v2103_v53 = vmul.f32 %v2757_v20, %v2093_v44 }
 0x742   : > { %v3189_v27 = vpop.eup %3188  ;;  %v2094_v29 = vmul.f32 %v3187_v51, %v2082_v24  ;;  %v2112_v55 = vadd.f32 %v2758_v43, %v2102_v46 }
 0x743   : > { %v2095_v56 = vmul.f32 %v3189_v27, %v2083_v30  ;;  %v2113_v32 = vadd.f32 %v2758_v43, %v2103_v53 }
 0x744   : > { %v2104_v38 = vmul.f32 %v2757_v20, %v2094_v29 }
 0x745   : > { %v2116_v59 = vpack.c.bf16 %v2113_v32, %v2112_v55  ;;  %v2105_v62 = vmul.f32 %v2757_v20, %v2095_v56 }
 0x746   : > { %v2114_v42 = vadd.f32 %v2758_v43, %v2104_v38 }
 0x747   : > { %2951 = vmatprep.mubr.msk.bf16.mxu0 %vm827_vm1, %v2116_v59  ;;  %v2115_v47 = vadd.f32 %v2758_v43, %v2105_v62 }
 0x749   : > { %v2117_v63 = vpack.c.bf16 %v2115_v47, %v2114_v42 }
 0x74b   : > { %2952 = vmatmul.mubr.msk.bf16.vlgmr.msra.gmra.mrb[36].mxu0 %vm827_vm1, %v2117_v63 }
 0x81e   : > { %v2953_v2 = vpop.f32.mrb[36].mxu0 }
 0x81f   : > { %v2190_v6 = vadd.f32 %v2953_v2, %v2759_v40  ;;  %v2181_v49 = vpop.f32.mrb[37].mxu0 }
 0x820   : > { %v2182_v52 = vadd.f32 %v2759_v40, %v2181_v49  ;;  %v2954_v10 = vpop.f32.mrb[38].mxu0 }
 0x821   : > { %v2193_v57 = vadd.f32 %v2954_v10, %v2759_v40  ;;  %v2184_v11 = vpop.f32.mrb[39].mxu0  ;;  %v2198_v48 = vmax.f32 %v2190_v6, 0.0 }
 0x822   : > { %v2185_v23 = vadd.f32 %v2759_v40, %v2184_v11  ;;  %v2196_v16 = vmax.f32 %v2182_v52, 0.0 }
 0x823   : > { %v2199_v14 = vmax.f32 %v2193_v57, 0.0  ;;  %v2771_v57 = vld [vmem:[%s4298_s26] ss:$0 sm:$0xff] }
 0x824   : > { %v2197_v50 = vmax.f32 %v2185_v23, 0.0 }
 0x825   : > { %v2201_v54 = vpack.c.bf16 %v2199_v14, %v2198_v48  ;;  %v2772_v14 = vld [vmem:[%s4299_s15] ss:$0 sm:$0xff] }
 0x826   : > { %v2200_v61 = vpack.c.bf16 %v2197_v50, %v2196_v16 }
 0x828   : > { %2963 = vmatprep.mubr.msk.bf16.mxu1 %vm2241_vm6, %v2200_v61 }
 0x829   : > { %2964 = vmatmul.mubr.msk.bf16.vlgmr.msra.gmra.mrb[36].mxu1 %vm2241_vm6, %v2201_v54 }
 0x8fc   : > { %v2965_v1 = vpop.f32.mrb[36].mxu1 }
 0x8fd   : > { %v2291_v18 = vadd.f32 %v2965_v1, %v2764_v17  ;;  %v2282_v21 = vpop.f32.mrb[37].mxu1 }
 0x8fe   : > { %v2283_v3 = vadd.f32 %v2764_v17, %v2282_v21  ;;  %v2966_v25 = vpop.f32.mrb[38].mxu1 }
 0x8ff   : > { %v4119_v4 = vadd.f32 %v2291_v18, %v2114_v42  ;;  %v2294_v22 = vadd.f32 %v2966_v25, %v2764_v17  ;;  %v2285_v0 = vpop.f32.mrb[39].mxu1 }
 0x900   : > { %v2286_v45 = vadd.f32 %v2764_v17, %v2285_v0  ;;  %v2297_v26 = vadd.f32 %v2283_v3, %v2112_v55 }
 0x901   : > { %v4121_v28 = vadd.f32 %v2294_v22, %v2115_v47  ;;  %v2309_v9 = vsel %vm827_vm1, %v4119_v4, 0.0  ;;  %v2321_v35 = vmul.f32 %v4119_v4, %v4119_v4 }
 0x902   : > { %2310 = vadd.xlane.f32.xlu0 %v2309_v9  ;;  %v2298_v31 = vadd.f32 %v2286_v45, %v2113_v32  ;;  %v2303_v33 = vsel %vm827_vm1, %v2297_v26, 0.0  ;;  %v2319_v13 = vmul.f32 %v2297_v26, %v2297_v26 }
 0x903   : > { %v2312_v7 = vsel %vm827_vm1, %v4121_v28, 0.0  ;;  %v2322_v12 = vmul.f32 %v4121_v28, %v4121_v28  ;;  %v2329_v39 = vsel %vm827_vm1, %v2321_v35, 0.0 }
 0x904   : > { %2313 = vadd.xlane.f32.xlu1 %v2312_v7  ;;  %v2306_v5 = vsel %vm827_vm1, %v2298_v31, 0.0  ;;  %v2320_v8 = vmul.f32 %v2298_v31, %v2298_v31  ;;  %v2323_v34 = vsel %vm827_vm1, %v2319_v13, 0.0 }
 0x905   : > { %v2332_v41 = vsel %vm827_vm1, %v2322_v12, 0.0 }
 0x906   : > { %2304 = vadd.xlane.f32.xlu0 %v2303_v33  ;;  %v2326_v36 = vsel %vm827_vm1, %v2320_v8, 0.0 }
 0x908   : > { %2307 = vadd.xlane.f32.xlu1 %v2306_v5 }
 0x90a   : > { %2324 = vadd.xlane.f32.xlu0 %v2323_v34 }
 0x90c   : > { %2327 = vadd.xlane.f32.xlu1 %v2326_v36 }
 0x90e   : > { %2330 = vadd.xlane.f32.xlu0 %v2329_v39 }
 0x910   : > { %2333 = vadd.xlane.f32.xlu1 %v2332_v41 }
 0x98f   : > { %v2311_v15 = vpop.xlane.xlu0 %2310 }
 0x990   : > { %v2317_v46 = vmul.f32 0.03125, %v2311_v15 }
 0x991   : > { %v2314_v20 = vpop.xlane.xlu1 %2313 }
 0x992   : > { %v2318_v53 = vmul.f32 0.03125, %v2314_v20  ;;  %v2341_v38 = vmul.f32 %v2317_v46, %v2317_v46  ;;  %v2349_v16 = vsub.f32 %v4119_v4, %v2317_v46 }
 0x993   : > { %v2305_v60 = vpop.xlane.xlu0 %2304 }
 0x994   : > { %v2315_v19 = vmul.f32 0.03125, %v2305_v60  ;;  %v2342_v47 = vmul.f32 %v2318_v53, %v2318_v53  ;;  %v2350_v17 = vsub.f32 %v4121_v28, %v2318_v53 }
 0x995   : > { %v2308_v43 = vpop.xlane.xlu1 %2307 }
 0x996   : > { %v2316_v44 = vmul.f32 0.03125, %v2308_v43  ;;  %v2339_v51 = vmul.f32 %v2315_v19, %v2315_v19  ;;  %v2347_v52 = vsub.f32 %v2297_v26, %v2315_v19 }
 0x997   : > { %v2325_v24 = vpop.xlane.xlu0 %2324 }
 0x998   : > { %v2335_v30 = vmul.f32 0.03125, %v2325_v24  ;;  %v2340_v29 = vmul.f32 %v2316_v44, %v2316_v44  ;;  %v2348_v11 = vsub.f32 %v2298_v31, %v2316_v44 }
 0x999   : > { %v2328_v27 = vpop.xlane.xlu1 %2327 }
 0x99a   : > { %v2343_v55 = vsub.f32 %v2335_v30, %v2339_v51  ;;  %v2336_v56 = vmul.f32 0.03125, %v2328_v27 }
 0x99b   : > { %v2331_v32 = vpop.xlane.xlu0 %2330 }
 0x99c   : > { %v2351_v59 = vadd.f32 1e-05, %v2343_v55  ;;  %v2344_v62 = vsub.f32 %v2336_v56, %v2340_v29  ;;  %v2337_v42 = vmul.f32 0.03125, %v2331_v32 }
 0x99d   : > { %v2334_v63 = vpop.xlane.xlu1 %2333 }
 0x99e   : > { %3190 = vrsqrt.f32 %v2351_v59  ;;  %v2352_v37 = vadd.f32 1e-05, %v2344_v62  ;;  %v2345_v58 = vsub.f32 %v2337_v42, %v2341_v38  ;;  %v2338_v40 = vmul.f32 0.03125, %v2334_v63 }
 0x9a0   : > { %3192 = vrsqrt.f32 %v2352_v37  ;;  %v2353_v2 = vadd.f32 1e-05, %v2345_v58  ;;  %v2346_v6 = vsub.f32 %v2338_v40, %v2342_v47 }
 0x9a2   : > { %3194 = vrsqrt.f32 %v2353_v2  ;;  %v2354_v49 = vadd.f32 1e-05, %v2346_v6 }
 0x9a4   : > { %3196 = vrsqrt.f32 %v2354_v49 }
 0x9a8   : > { %v3191_v10 = vpop.eup %3190 }
 0x9a9   : > { %v2359_v23 = vmul.f32 %v3191_v10, %v2347_v52 }
 0x9aa   : > { %v3193_v48 = vpop.eup %3192 }
 0x9ab   : > { %v2369_v50 = vmul.f32 %v2771_v57, %v2359_v23  ;;  %v2360_v54 = vmul.f32 %v3193_v48, %v2348_v11 }
 0x9ac   : > { %v3195_v61 = vpop.eup %3194 }
 0x9ad   : > { %v2370_v1 = vmul.f32 %v2771_v57, %v2360_v54  ;;  %v2361_v18 = vmul.f32 %v3195_v61, %v2349_v16  ;;  %v2379_v21 = vadd.f32 %v2772_v14, %v2369_v50 }
 0x9ae   : > { %v3197_v3 = vpop.eup %3196 }
 0x9af   : > { %v2371_v25 = vmul.f32 %v2771_v57, %v2361_v18  ;;  %v2362_v22 = vmul.f32 %v3197_v3, %v2350_v17  ;;  %v2380_v0 = vadd.f32 %v2772_v14, %v2370_v1  ;;  %2383 = vst.msk [vmem:[#allocation8] sm:$0xff] %vm827_vm1, %v2379_v21 }
 0x9b1   : > { %v2372_v45 = vmul.f32 %v2771_v57, %v2362_v22  ;;  %v2381_v26 = vadd.f32 %v2772_v14, %v2371_v25  ;;  %2384 = vst.msk [vmem:[#allocation8 + $0x8] sm:$0xff] %vm827_vm1, %v2380_v0 }
 0x9b3   : > { %v2382_v4 = vadd.f32 %v2772_v14, %v2372_v45  ;;  %2385 = vst.msk [vmem:[#allocation8 + $0x10] sm:$0xff] %vm827_vm1, %v2381_v26 }
 0x9b5   : > { %2386 = vst.msk [vmem:[#allocation8 + $0x18] sm:$0xff] %vm827_vm1, %v2382_v4 }
 0x9b6   : > { %3305 = shalt.err (!%p3302_p8)
}
 0x9b7   : > { %s4301_s18 = sld [smem:[#allocation35_spill]]  ;;  %p4303_p3 = pmov %p4300_p6 }
 0x9bd   : > { %s4302_s16 = smov %s4301_s18  ;;  %s3306_s17 = scalar_lea.hbm %s4301_s18, 512 }
 0x9be   : > { %p3307_p1 = scmp.ne.s32.totalorder %s4302_s16, %s3306_s17  ;;  %p3312_p13 = scmp.lt.u32.totalorder %s3306_s17, %s4302_s16 }
 0x9c0   : > { %p3308_p4 = pnand %p3307_p1, %p4303_p3 }
 0x9c2   : > { %p3309_p2 = pneg %p3308_p4 }
 0x9c4   : > { %p3314_p5 = pnand %p3312_p13, %p3309_p2 }
 0x9c6   : > { %3317 = shalt.err (!%p3314_p5)
}
 0x9c7   : > { %s3404_s11 = smov 128   ;;  %p4304_p7 = pmov %p4303_p3 }
 0x9c8   : > { %s2388_s4 = scalar_lea.sflag [#allocation10], %s3673_s0 }
 0x9c9   : > { %2974 = dma.vmem_to_hbm [thread:$0]  (%p4304_p7), %s2403_s14, 512, %s4302_s16, [#allocation4], %s3404_s11, %s3404_s11, %s3400_s28  }
 0x9ca   : > { %s4305_s30 = sld [smem:[#allocation23_spill]]  ;;  %s2784_s26 = sshll.u32 %s3372_s21, 8 }
 0x9cb   : > { %s2437_s15 = sshll.u32 %s3734_s25, 4  ;;  %s4306_s20 = sld [smem:[#allocation36_spill]]  ;;  %s2438_s15 = int_to_ptr.vmem [resolvable:$true] %s2437_s15 }
 0x9cc   : > { %s3405_s18 = smov 256   ;;  %s3406_s0 = smov 512  }
 0x9cd   : > { %s3407_s28 = smov 2   ;;  %s3408_s14 = smov 128  }
 0x9ce   : > { %s3409_s21 = smov 8   ;;  %s3410_s25 = smov [#allocation11]  }
 0x9cf   : > { %s3411_s17 = smov 0   ;;  %p4308_p12 = pmov %p4303_p3 }
 0x9d0   : > { %p4307_p6 = scmp.ne.s32.totalorder %s4305_s30, 0 }
 0x9d1   : > { %s2420_s13 = scalar_lea.hbm %s4306_s20, %s2784_s26 }
 0x9d2   : > { %2975 = sst [smem:[#allocation12]] (%p4307_p6), %s3405_s18 }
 0x9d3   : > { %2976 = sst [smem:[#allocation12 + $0x1]] (%p4307_p6), %s3406_s0 }
 0x9d4   : > { %2977 = sst [smem:[#allocation12 + $0x2]] (%p4307_p6), %s3407_s28 }
 0x9d5   : > { %2978 = sst [smem:[#allocation12 + $0x3]] (%p4307_p6), %s3408_s14 }
 0x9d6   : > { %2979 = sst [smem:[#allocation12 + $0x4]] (%p4307_p6), %s3408_s14 }
 0x9d7   : > { %2980 = sst [smem:[#allocation12 + $0x5]] (%p4307_p6), %s3409_s21 }
 0x9d8   : > { %2981 = dma.general (%p4307_p6), %s2438_s15, 512, %s2420_s13, %s2388_s4, %s3410_s25, [#allocation12], %s3411_s17, 0  }
 0x9d9   : > { %3351 = dma.done.wait (%p4308_p12), [#allocation4], 512   ;;  %p4309_p9 = pmov %p4303_p3 }
 0x9db   : > { %3353 = vsyncadd (%p4309_p9), [#allocation4], 4294966784 }
 0x9dc PF: > { %s4310_s12 = sld [smem:[#allocation17_spill]]  ;;  %s4311_s2 = sld [smem:[#allocation25_spill]] }
 0x9dd   : > { %s4312_s19 = sld [smem:[#allocation21_spill]] }
 0x9e2   : > { %s2469_s23 = sand.u32 1, %s4310_s12   ;;  %p4313_p11 = scmp.ne.s32.totalorder %s4311_s2, 0 }
 0x9e3   : > { %p4314_p10 = scmp.ge.s32.totalorder %s4312_s19, 2  ;;  %s2470_s11 = scalar_lea.sflag [#allocation10], %s2469_s23 }
 0x9e5   : > { %p2996_p0 = pnand %p4314_p10, %p4313_p11 }
 0x9e7   : > { %3355 = dma.done.wait (!%p2996_p0), %s2470_s11, 512  }
 0x9e8   : > { %3357 = vsyncadd (!%p2996_p0), %s2470_s11, 4294966784  ;;  %s36_s23 = sadd.s32 1, %s4312_s19   ;;  %s4315_s18 = sld [smem:[#allocation18_spill]] }
 0x9e9   : > { %p33_p8 = scmp.ge.s32.totalorder %s36_s23, 4   ;;  %s4316_s19 = sld [smem:[#allocation19_spill]] }
 0x9ea   : > { %s4317_s20 = sld [smem:[#allocation24_spill]]  ;;  %s4318_s21 = sld [smem:[#allocation20_spill]] }
 0x9eb   : > { %s4319_s22 = sld [smem:[#allocation22_spill]]  ;;  %35 = sbr.rel (!%p33_p8) target bundleno = 21 (0x15), region = 198 }
 0x9f2   :  { %2475 = vsyncpa [#allocation3], 1 }
 0x9f3   :  { %2477 = vsyncpa [#allocation3 + $0x1], 1 }
 0x9f4   :  { %2478 = vsyncpa [#allocation6], 1 }
 0x9f5   :  { %2480 = vsyncpa [#allocation6 + $0x1], 1 }
 0x9f6   :  { %2481 = vsyncpa [#allocation4], 1 }
 0x9f7   :  { %2483 = vsyncpa [#allocation4 + $0x1], 1 }
 0x9f8   :  { %2484 = vsyncpa [#allocation10], 1 }
 0x9f9   :  { %2486 = vsyncpa [#allocation10 + $0x1], 1 }

</bundles_post_ra>
